<compile_context>
chip_gen: v7x
topology: tpu7x:2x2x1
jax: 0.10.0
libtpu: 0.0.40
codegen_flags: <defaults>
</compile_context>

<pallas_src>
import functools

import jax
import jax.numpy as jnp
from jax.experimental import pallas as pl
from jax.experimental.pallas import tpu as pltpu

# ----------------------------- model config ---------------------------------
INPUT_DIM = 4
OUTPUT_DIM = 3
HIDDEN_DIM = 32
NUM_LAYER = 2
SEQ_LEN = 8
BATCH = 2

_VMEM_SPEC = pl.BlockSpec(memory_space=pltpu.MemorySpace.VMEM)


def _round_up(n, m):
    return ((n + m - 1) // m) * m


def _slab_layout(input_dim, hidden_dim, num_layer):
    """Row offsets of each parameter inside the packed (rows, 4H) weight slab.

    Every section starts on an 8-row boundary so in-kernel loads are
    sublane-aligned.
    """
    layer_offs = []
    off = 0
    for l in range(num_layer):
        d_in = input_dim if l == 0 else hidden_dim
        wih_off = off
        off += _round_up(d_in, 8)
        whh_off = off
        off += _round_up(hidden_dim, 8)
        b_off = off
        off += 8
        layer_offs.append((wih_off, whh_off, b_off, d_in))
    wd_off = off
    off += _round_up(hidden_dim, 8)
    bd_off = off
    off += 8
    return layer_offs, wd_off, bd_off, off


# ------------------------------ fused kernel ---------------------------------
def _make_fused_kernel(num_layer, seq_len, batch, input_dim, hidden_dim, output_dim):
    """All LSTM layers (wavefront-interleaved) + dense head, one pallas_call.

    Ref order:
      x_ref:  (B, T, D)      input, caller layout (batch_first) -- no transpose
      h0_ref: (L, B, H)      initial hidden states   (aliased to ht_ref)
      c0_ref: (L, B, H)      initial cell states     (aliased to ct_ref)
      w_ref:  (R, 4H)        packed weight slab (all layers + dense head)
      -- outputs --
      y_ref:  (B, O)
      ht_ref: (L, B, H)
      ct_ref: (L, B, H)
    """
    T, B, D, H, O = seq_len, batch, input_dim, hidden_dim, output_dim
    layer_offs, wd_off, bd_off, _ = _slab_layout(D, H, num_layer)

    def kernel(x_ref, h0_ref, c0_ref, w_ref, y_ref, ht_ref, ct_ref):
        x = x_ref[...]                                   # (B, T, D), loaded once

        # ---- unpack the packed weight slab (static, sublane-aligned offsets) --
        wih, whh, bias = [], [], []
        for (wih_off, whh_off, b_off, d_in) in layer_offs:
            wih.append(w_ref[wih_off:wih_off + d_in, :])     # (d_in, 4H)
            whh.append(w_ref[whh_off:whh_off + H, :])        # (H,   4H)
            bias.append(w_ref[b_off:b_off + 1, :])           # (1,   4H)  b_ih+b_hh
        wd = w_ref[wd_off:wd_off + H, :]                     # (H, 4H), cols 0:O real
        bd = w_ref[bd_off:bd_off + 1, :]                     # (1, 4H), cols 0:O real

        def cell(pre, h, c, w_hh):
            # pre already contains (input @ W_ih + b_ih + b_hh)
            gates = pre + jnp.dot(h, w_hh, preferred_element_type=jnp.float32)
            s = jax.nn.sigmoid(gates)            # full-width EUP over (B, 4H)
            th = jnp.tanh(gates)                 # full-width EUP over (B, 4H)
            i = s[:, 0:H]                        # offset-0 slice: free
            f = s[:, H:2 * H]                    # 1 XLU lane rotate
            g = th[:, 2 * H:3 * H]               # 1 XLU lane rotate
            o = s[:, 3 * H:4 * H]                # 1 XLU lane rotate
            c_new = f * c + i * g
            h_new = o * jnp.tanh(c_new)
            return h_new, c_new

        h = [h0_ref[l] for l in range(num_layer)]            # (B, H) each
        c = [c0_ref[l] for l in range(num_layer)]
        # below[l]: layer l-1's output from the previous super-step.
        below = [None] * num_layer

        # Wavefront order: super-step s runs layer-l's cell for t = s - l, so
        # per super-step the active cells are mutually independent and the
        # dependent chain is T + L - 1 cells instead of T * L.
        for s_step in range(T + num_layer - 1):
            produced = [None] * num_layer
            for l in range(num_layer):
                t = s_step - l
                if 0 <= t < T:
                    if l == 0:
                        # Per-step input projection: independent of the
                        # recurrence, so the scheduler hoists/overlaps it.
                        pre = jnp.dot(x[:, t, :], wih[0],
                                      preferred_element_type=jnp.float32) + bias[0]
                    else:
                        pre = jnp.dot(below[l], wih[l],
                                      preferred_element_type=jnp.float32) + bias[l]
                    h[l], c[l] = cell(pre, h[l], c[l], whh[l])
                    produced[l] = h[l]
            # Commit this super-step's outputs for the layer above (next step).
            for l in range(num_layer - 1):
                if produced[l] is not None:
                    below[l + 1] = produced[l]

        # Final states (epilogue-only small stores; ht/ct are input-aliased).
        for l in range(num_layer):
            ht_ref[l] = h[l]
            ct_ref[l] = c[l]

        # Dense head on the last layer's final hidden state.  wd is padded to
        # 4H lanes (zeros past O) so the matmul is lane-dense; the (B, O)
        # output store is a single tiny epilogue store.
        y_full = jnp.dot(h[num_layer - 1], wd,
                         preferred_element_type=jnp.float32) + bd     # (B, 4H)
        y_ref[...] = y_full[:, 0:O]

    return kernel


# ------------------------------- wrapper -------------------------------------
@functools.partial(jax.jit, static_argnames=("output_dim",), donate_argnums=(1, 2))
def lstm_forward(x, ht, ct, w_slab, output_dim=OUTPUT_DIM):
    """Pallas forward matching torch LSTM.forward(x, ht, ct) (eval mode).

    x:      (B, T, input_dim)   batch_first, exactly as the caller holds it
    ht, ct: (num_layer, B, H)   donated & updated in place
    w_slab: packed weight slab from pack_params()
    returns (out:(B, output_dim), ht:(num_layer,B,H), ct:(num_layer,B,H))
    """
    B, T, D = x.shape
    num_layer, _, H = ht.shape
    O = output_dim
    h4 = 4 * H

    # Rough advisory cost estimate (helps XLA schedule the tiny custom call).
    flops = 0
    for l in range(num_layer):
        d_in = D if l == 0 else H
        flops += 2 * B * d_in * h4 * T       # input projections
        flops += 2 * B * H * h4 * T          # recurrent matmuls
        flops += 12 * B * h4 * T             # gate elementwise
    flops += 2 * B * H * h4                  # dense head (padded width)
    transcendentals = num_layer * T * (2 * B * h4 + 2 * B * H)
    bytes_accessed = 4 * (x.size + 2 * ht.size + 2 * ct.size + w_slab.size + B * O)

    kernel = _make_fused_kernel(num_layer, T, B, D, H, O)
    y, ht_out, ct_out = pl.pallas_call(
        kernel,
        out_shape=(
            jax.ShapeDtypeStruct((B, O), jnp.float32),
            jax.ShapeDtypeStruct((num_layer, B, H), jnp.float32),
            jax.ShapeDtypeStruct((num_layer, B, H), jnp.float32),
        ),
        in_specs=[_VMEM_SPEC] * 4,
        out_specs=(_VMEM_SPEC, _VMEM_SPEC, _VMEM_SPEC),
        input_output_aliases={1: 1, 2: 2},   # ht -> ht_out, ct -> ct_out
        cost_estimate=pl.CostEstimate(
            flops=int(flops),
            transcendentals=int(transcendentals),
            bytes_accessed=int(bytes_accessed),
        ),
    )(x, ht, ct, w_slab)
    return y, ht_out, ct_out


# --------------------------- parameter handling -------------------------------
def init_params(key, input_dim, hidden_dim, output_dim, num_layer):
    bound = 1.0 / jnp.sqrt(hidden_dim)
    layers = []
    for l in range(num_layer):
        d_in = input_dim if l == 0 else hidden_dim
        key, k1, k2, k3, k4 = jax.random.split(key, 5)
        w_ih = jax.random.uniform(k1, (d_in, 4 * hidden_dim), jnp.float32, -bound, bound)
        w_hh = jax.random.uniform(k2, (hidden_dim, 4 * hidden_dim), jnp.float32, -bound, bound)
        b_ih = jax.random.uniform(k3, (4 * hidden_dim,), jnp.float32, -bound, bound)
        b_hh = jax.random.uniform(k4, (4 * hidden_dim,), jnp.float32, -bound, bound)
        layers.append((w_ih, w_hh, (b_ih + b_hh).reshape(1, 4 * hidden_dim)))
    key, k1, k2 = jax.random.split(key, 3)
    dbound = 1.0 / jnp.sqrt(hidden_dim)
    dense_w = jax.random.uniform(k1, (hidden_dim, output_dim), jnp.float32, -dbound, dbound)
    dense_b = jax.random.uniform(k2, (1, output_dim), jnp.float32, -dbound, dbound)
    return {"layers": layers, "dense_w": dense_w, "dense_b": dense_b}


def pack_params(params, input_dim, hidden_dim, output_dim, num_layer):
    """One-time packing of all weights into a single (R, 4H) f32 slab."""
    h4 = 4 * hidden_dim
    layer_offs, wd_off, bd_off, total = _slab_layout(input_dim, hidden_dim, num_layer)
    slab = jnp.zeros((total, h4), jnp.float32)
    for l, (wih_off, whh_off, b_off, d_in) in enumerate(layer_offs):
        w_ih, w_hh, b = params["layers"][l]
        slab = slab.at[wih_off:wih_off + d_in, :].set(w_ih)
        slab = slab.at[whh_off:whh_off + hidden_dim, :].set(w_hh)
        slab = slab.at[b_off:b_off + 1, :].set(b)
    slab = slab.at[wd_off:wd_off + hidden_dim, :output_dim].set(params["dense_w"])
    slab = slab.at[bd_off:bd_off + 1, :output_dim].set(params["dense_b"])
    return slab


# ------------------------------ reference ------------------------------------
def lstm_forward_ref(x, ht, ct, params, num_layer=NUM_LAYER):
    """Pure-JAX reference (mirrors torch.nn.LSTM eval-mode semantics)."""
    B, T, _ = x.shape
    H = ht.shape[-1]
    layer_in = x
    hs, cs = [], []
    for l in range(num_layer):
        wih, whh, b = params["layers"][l]
        h, c = ht[l], ct[l]
        outs = []
        for t in range(T):
            gates = layer_in[:, t, :] @ wih + h @ whh + b
            i = jax.nn.sigmoid(gates[:, 0:H])
            f = jax.nn.sigmoid(gates[:, H:2 * H])
            g = jnp.tanh(gates[:, 2 * H:3 * H])
            o = jax.nn.sigmoid(gates[:, 3 * H:4 * H])
            c = f * c + i * g
            h = o * jnp.tanh(c)
            outs.append(h)
        layer_in = jnp.stack(outs, axis=1)
        hs.append(h)
        cs.append(c)
    y = layer_in[:, -1, :] @ params["dense_w"] + params["dense_b"]
    return y, jnp.stack(hs), jnp.stack(cs)


# --------------------------------- main ---------------------------------------
if __name__ == "__main__":
    key = jax.random.PRNGKey(0)
    kp, kx, kh, kc = jax.random.split(key, 4)

    params = init_params(kp, INPUT_DIM, HIDDEN_DIM, OUTPUT_DIM, NUM_LAYER)

    x = jax.random.normal(kx, (BATCH, SEQ_LEN, INPUT_DIM), jnp.float32)
    ht = jax.random.normal(kh, (NUM_LAYER, BATCH, HIDDEN_DIM), jnp.float32)
    ct = jax.random.normal(kc, (NUM_LAYER, BATCH, HIDDEN_DIM), jnp.float32)

    # Reference first: ht/ct are donated to (and updated in place by) the
    # fused kernel call below.
    y_ref, h_ref, c_ref = lstm_forward_ref(x, ht, ct, params)
    jax.block_until_ready((y_ref, h_ref, c_ref))

    w_slab = pack_params(params, INPUT_DIM, HIDDEN_DIM, OUTPUT_DIM, NUM_LAYER)

    y, h_out, c_out = lstm_forward(x, ht, ct, w_slab, output_dim=OUTPUT_DIM)
    jax.block_until_ready((y, h_out, c_out))

    assert jnp.allclose(y, y_ref, atol=1e-5, rtol=1e-5)
    assert jnp.allclose(h_out, h_ref, atol=1e-5, rtol=1e-5)
    assert jnp.allclose(c_out, c_ref, atol=1e-5, rtol=1e-5)

    print("KERNEL_OK")
</pallas_src>

<mosaic_0001>
module attributes {stable_mosaic.version = 11 : i64} {
  func.func @kernel(%arg0: memref<2x8x4xf32, #tpu.memory_space<vmem>>, %arg1: memref<2x2x32xf32, #tpu.memory_space<vmem>>, %arg2: memref<2x2x32xf32, #tpu.memory_space<vmem>>, %arg3: memref<160x128xf32, #tpu.memory_space<vmem>>, %arg4: memref<2x3xf32, #tpu.memory_space<vmem>>, %arg5: memref<2x2x32xf32, #tpu.memory_space<vmem>>, %arg6: memref<2x2x32xf32, #tpu.memory_space<vmem>>) attributes {dimension_semantics = [], scalar_prefetch = 0 : i64, scratch_operands = 0 : i64, tpu.core_type = #tpu.core_type<tc>} {
    %c0 = arith.constant 0 : index
    %c0_0 = arith.constant 0 : index
    %c0_1 = arith.constant 0 : index
    %0 = vector.load %arg0[%c0, %c0_0, %c0_1] : memref<2x8x4xf32, #tpu.memory_space<vmem>>, vector<2x8x4xf32>
    %c0_2 = arith.constant 0 : index
    %c0_3 = arith.constant 0 : index
    %1 = vector.load %arg3[%c0_2, %c0_3] : memref<160x128xf32, #tpu.memory_space<vmem>>, vector<4x128xf32>
    %c8 = arith.constant 8 : index
    %c0_4 = arith.constant 0 : index
    %2 = vector.load %arg3[%c8, %c0_4] : memref<160x128xf32, #tpu.memory_space<vmem>>, vector<32x128xf32>
    %c40 = arith.constant 40 : index
    %c0_5 = arith.constant 0 : index
    %3 = vector.load %arg3[%c40, %c0_5] : memref<160x128xf32, #tpu.memory_space<vmem>>, vector<1x128xf32>
    %c48 = arith.constant 48 : index
    %c0_6 = arith.constant 0 : index
    %4 = vector.load %arg3[%c48, %c0_6] : memref<160x128xf32, #tpu.memory_space<vmem>>, vector<32x128xf32>
    %c80 = arith.constant 80 : index
    %c0_7 = arith.constant 0 : index
    %5 = vector.load %arg3[%c80, %c0_7] : memref<160x128xf32, #tpu.memory_space<vmem>>, vector<32x128xf32>
    %c112 = arith.constant 112 : index
    %c0_8 = arith.constant 0 : index
    %6 = vector.load %arg3[%c112, %c0_8] : memref<160x128xf32, #tpu.memory_space<vmem>>, vector<1x128xf32>
    %c120 = arith.constant 120 : index
    %c0_9 = arith.constant 0 : index
    %7 = vector.load %arg3[%c120, %c0_9] : memref<160x128xf32, #tpu.memory_space<vmem>>, vector<32x128xf32>
    %c152 = arith.constant 152 : index
    %c0_10 = arith.constant 0 : index
    %8 = vector.load %arg3[%c152, %c0_10] : memref<160x128xf32, #tpu.memory_space<vmem>>, vector<1x128xf32>
    %c0_11 = arith.constant 0 : index
    %c0_12 = arith.constant 0 : index
    %c0_13 = arith.constant 0 : index
    %9 = vector.load %arg1[%c0_11, %c0_12, %c0_13] : memref<2x2x32xf32, #tpu.memory_space<vmem>>, vector<1x2x32xf32>
    %10 = vector.shape_cast %9 : vector<1x2x32xf32> to vector<2x32xf32>
    %c1 = arith.constant 1 : index
    %c0_14 = arith.constant 0 : index
    %c0_15 = arith.constant 0 : index
    %11 = vector.load %arg1[%c1, %c0_14, %c0_15] : memref<2x2x32xf32, #tpu.memory_space<vmem>>, vector<1x2x32xf32>
    %12 = vector.shape_cast %11 : vector<1x2x32xf32> to vector<2x32xf32>
    %c0_16 = arith.constant 0 : index
    %c0_17 = arith.constant 0 : index
    %c0_18 = arith.constant 0 : index
    %13 = vector.load %arg2[%c0_16, %c0_17, %c0_18] : memref<2x2x32xf32, #tpu.memory_space<vmem>>, vector<1x2x32xf32>
    %14 = vector.shape_cast %13 : vector<1x2x32xf32> to vector<2x32xf32>
    %c1_19 = arith.constant 1 : index
    %c0_20 = arith.constant 0 : index
    %c0_21 = arith.constant 0 : index
    %15 = vector.load %arg2[%c1_19, %c0_20, %c0_21] : memref<2x2x32xf32, #tpu.memory_space<vmem>>, vector<1x2x32xf32>
    %16 = vector.shape_cast %15 : vector<1x2x32xf32> to vector<2x32xf32>
    %17 = vector.extract_strided_slice %0 {offsets = [0, 0, 0], sizes = [2, 1, 4], strides = [1, 1, 1]} : vector<2x8x4xf32> to vector<2x1x4xf32>
    %18 = vector.shape_cast %17 : vector<2x1x4xf32> to vector<2x4xf32>
    %cst = arith.constant dense<0.000000e+00> : vector<2x128xf32>
    %19 = tpu.matmul %18, %1, %cst {dimension_numbers = #tpu.dot_dimension_numbers<[1], [0], [0], [1], [0, 0, 1, 1], [], []>} : vector<2x4xf32>, vector<4x128xf32>, vector<2x128xf32> -> vector<2x128xf32>
    %20 = vector.broadcast %3 : vector<1x128xf32> to vector<2x128xf32>
    %21 = arith.addf %19, %20 : vector<2x128xf32>
    %cst_22 = arith.constant dense<0.000000e+00> : vector<2x128xf32>
    %22 = tpu.matmul %10, %2, %cst_22 {dimension_numbers = #tpu.dot_dimension_numbers<[1], [0], [0], [1], [0, 0, 1, 1], [], []>} : vector<2x32xf32>, vector<32x128xf32>, vector<2x128xf32> -> vector<2x128xf32>
    %23 = arith.addf %21, %22 : vector<2x128xf32>
    %24 = arith.negf %23 : vector<2x128xf32>
    %25 = math.exp %24 : vector<2x128xf32>
    %cst_23 = arith.constant 1.000000e+00 : f32
    %26 = vector.broadcast %cst_23 : f32 to vector<2x128xf32>
    %27 = arith.addf %26, %25 : vector<2x128xf32>
    %28 = arith.divf %26, %27 : vector<2x128xf32>
    %29 = math.tanh %23 : vector<2x128xf32>
    %30 = vector.extract_strided_slice %28 {offsets = [0, 0], sizes = [2, 32], strides = [1, 1]} : vector<2x128xf32> to vector<2x32xf32>
    %31 = vector.extract_strided_slice %28 {offsets = [0, 32], sizes = [2, 32], strides = [1, 1]} : vector<2x128xf32> to vector<2x32xf32>
    %32 = vector.extract_strided_slice %29 {offsets = [0, 64], sizes = [2, 32], strides = [1, 1]} : vector<2x128xf32> to vector<2x32xf32>
    %33 = vector.extract_strided_slice %28 {offsets = [0, 96], sizes = [2, 32], strides = [1, 1]} : vector<2x128xf32> to vector<2x32xf32>
    %34 = arith.mulf %31, %14 : vector<2x32xf32>
    %35 = arith.mulf %30, %32 : vector<2x32xf32>
    %36 = arith.addf %34, %35 : vector<2x32xf32>
    %37 = math.tanh %36 : vector<2x32xf32>
    %38 = arith.mulf %33, %37 : vector<2x32xf32>
    %39 = vector.extract_strided_slice %0 {offsets = [0, 1, 0], sizes = [2, 1, 4], strides = [1, 1, 1]} : vector<2x8x4xf32> to vector<2x1x4xf32>
    %40 = vector.shape_cast %39 : vector<2x1x4xf32> to vector<2x4xf32>
    %cst_24 = arith.constant dense<0.000000e+00> : vector<2x128xf32>
    %41 = tpu.matmul %40, %1, %cst_24 {dimension_numbers = #tpu.dot_dimension_numbers<[1], [0], [0], [1], [0, 0, 1, 1], [], []>} : vector<2x4xf32>, vector<4x128xf32>, vector<2x128xf32> -> vector<2x128xf32>
    %42 = vector.broadcast %3 : vector<1x128xf32> to vector<2x128xf32>
    %43 = arith.addf %41, %42 : vector<2x128xf32>
    %cst_25 = arith.constant dense<0.000000e+00> : vector<2x128xf32>
    %44 = tpu.matmul %38, %2, %cst_25 {dimension_numbers = #tpu.dot_dimension_numbers<[1], [0], [0], [1], [0, 0, 1, 1], [], []>} : vector<2x32xf32>, vector<32x128xf32>, vector<2x128xf32> -> vector<2x128xf32>
    %45 = arith.addf %43, %44 : vector<2x128xf32>
    %46 = arith.negf %45 : vector<2x128xf32>
    %47 = math.exp %46 : vector<2x128xf32>
    %cst_26 = arith.constant 1.000000e+00 : f32
    %48 = vector.broadcast %cst_26 : f32 to vector<2x128xf32>
    %49 = arith.addf %48, %47 : vector<2x128xf32>
    %50 = arith.divf %48, %49 : vector<2x128xf32>
    %51 = math.tanh %45 : vector<2x128xf32>
    %52 = vector.extract_strided_slice %50 {offsets = [0, 0], sizes = [2, 32], strides = [1, 1]} : vector<2x128xf32> to vector<2x32xf32>
    %53 = vector.extract_strided_slice %50 {offsets = [0, 32], sizes = [2, 32], strides = [1, 1]} : vector<2x128xf32> to vector<2x32xf32>
    %54 = vector.extract_strided_slice %51 {offsets = [0, 64], sizes = [2, 32], strides = [1, 1]} : vector<2x128xf32> to vector<2x32xf32>
    %55 = vector.extract_strided_slice %50 {offsets = [0, 96], sizes = [2, 32], strides = [1, 1]} : vector<2x128xf32> to vector<2x32xf32>
    %56 = arith.mulf %53, %36 : vector<2x32xf32>
    %57 = arith.mulf %52, %54 : vector<2x32xf32>
    %58 = arith.addf %56, %57 : vector<2x32xf32>
    %59 = math.tanh %58 : vector<2x32xf32>
    %60 = arith.mulf %55, %59 : vector<2x32xf32>
    %cst_27 = arith.constant dense<0.000000e+00> : vector<2x128xf32>
    %61 = tpu.matmul %38, %4, %cst_27 {dimension_numbers = #tpu.dot_dimension_numbers<[1], [0], [0], [1], [0, 0, 1, 1], [], []>} : vector<2x32xf32>, vector<32x128xf32>, vector<2x128xf32> -> vector<2x128xf32>
    %62 = vector.broadcast %6 : vector<1x128xf32> to vector<2x128xf32>
    %63 = arith.addf %61, %62 : vector<2x128xf32>
    %cst_28 = arith.constant dense<0.000000e+00> : vector<2x128xf32>
    %64 = tpu.matmul %12, %5, %cst_28 {dimension_numbers = #tpu.dot_dimension_numbers<[1], [0], [0], [1], [0, 0, 1, 1], [], []>} : vector<2x32xf32>, vector<32x128xf32>, vector<2x128xf32> -> vector<2x128xf32>
    %65 = arith.addf %63, %64 : vector<2x128xf32>
    %66 = arith.negf %65 : vector<2x128xf32>
    %67 = math.exp %66 : vector<2x128xf32>
    %cst_29 = arith.constant 1.000000e+00 : f32
    %68 = vector.broadcast %cst_29 : f32 to vector<2x128xf32>
    %69 = arith.addf %68, %67 : vector<2x128xf32>
    %70 = arith.divf %68, %69 : vector<2x128xf32>
    %71 = math.tanh %65 : vector<2x128xf32>
    %72 = vector.extract_strided_slice %70 {offsets = [0, 0], sizes = [2, 32], strides = [1, 1]} : vector<2x128xf32> to vector<2x32xf32>
    %73 = vector.extract_strided_slice %70 {offsets = [0, 32], sizes = [2, 32], strides = [1, 1]} : vector<2x128xf32> to vector<2x32xf32>
    %74 = vector.extract_strided_slice %71 {offsets = [0, 64], sizes = [2, 32], strides = [1, 1]} : vector<2x128xf32> to vector<2x32xf32>
    %75 = vector.extract_strided_slice %70 {offsets = [0, 96], sizes = [2, 32], strides = [1, 1]} : vector<2x128xf32> to vector<2x32xf32>
    %76 = arith.mulf %73, %16 : vector<2x32xf32>
    %77 = arith.mulf %72, %74 : vector<2x32xf32>
    %78 = arith.addf %76, %77 : vector<2x32xf32>
    %79 = math.tanh %78 : vector<2x32xf32>
    %80 = arith.mulf %75, %79 : vector<2x32xf32>
    %81 = vector.extract_strided_slice %0 {offsets = [0, 2, 0], sizes = [2, 1, 4], strides = [1, 1, 1]} : vector<2x8x4xf32> to vector<2x1x4xf32>
    %82 = vector.shape_cast %81 : vector<2x1x4xf32> to vector<2x4xf32>
    %cst_30 = arith.constant dense<0.000000e+00> : vector<2x128xf32>
    %83 = tpu.matmul %82, %1, %cst_30 {dimension_numbers = #tpu.dot_dimension_numbers<[1], [0], [0], [1], [0, 0, 1, 1], [], []>} : vector<2x4xf32>, vector<4x128xf32>, vector<2x128xf32> -> vector<2x128xf32>
    %84 = vector.broadcast %3 : vector<1x128xf32> to vector<2x128xf32>
    %85 = arith.addf %83, %84 : vector<2x128xf32>
    %cst_31 = arith.constant dense<0.000000e+00> : vector<2x128xf32>
    %86 = tpu.matmul %60, %2, %cst_31 {dimension_numbers = #tpu.dot_dimension_numbers<[1], [0], [0], [1], [0, 0, 1, 1], [], []>} : vector<2x32xf32>, vector<32x128xf32>, vector<2x128xf32> -> vector<2x128xf32>
    %87 = arith.addf %85, %86 : vector<2x128xf32>
    %88 = arith.negf %87 : vector<2x128xf32>
    %89 = math.exp %88 : vector<2x128xf32>
    %cst_32 = arith.constant 1.000000e+00 : f32
    %90 = vector.broadcast %cst_32 : f32 to vector<2x128xf32>
    %91 = arith.addf %90, %89 : vector<2x128xf32>
    %92 = arith.divf %90, %91 : vector<2x128xf32>
    %93 = math.tanh %87 : vector<2x128xf32>
    %94 = vector.extract_strided_slice %92 {offsets = [0, 0], sizes = [2, 32], strides = [1, 1]} : vector<2x128xf32> to vector<2x32xf32>
    %95 = vector.extract_strided_slice %92 {offsets = [0, 32], sizes = [2, 32], strides = [1, 1]} : vector<2x128xf32> to vector<2x32xf32>
    %96 = vector.extract_strided_slice %93 {offsets = [0, 64], sizes = [2, 32], strides = [1, 1]} : vector<2x128xf32> to vector<2x32xf32>
    %97 = vector.extract_strided_slice %92 {offsets = [0, 96], sizes = [2, 32], strides = [1, 1]} : vector<2x128xf32> to vector<2x32xf32>
    %98 = arith.mulf %95, %58 : vector<2x32xf32>
    %99 = arith.mulf %94, %96 : vector<2x32xf32>
    %100 = arith.addf %98, %99 : vector<2x32xf32>
    %101 = math.tanh %100 : vector<2x32xf32>
    %102 = arith.mulf %97, %101 : vector<2x32xf32>
    %cst_33 = arith.constant dense<0.000000e+00> : vector<2x128xf32>
    %103 = tpu.matmul %60, %4, %cst_33 {dimension_numbers = #tpu.dot_dimension_numbers<[1], [0], [0], [1], [0, 0, 1, 1], [], []>} : vector<2x32xf32>, vector<32x128xf32>, vector<2x128xf32> -> vector<2x128xf32>
    %104 = vector.broadcast %6 : vector<1x128xf32> to vector<2x128xf32>
    %105 = arith.addf %103, %104 : vector<2x128xf32>
    %cst_34 = arith.constant dense<0.000000e+00> : vector<2x128xf32>
    %106 = tpu.matmul %80, %5, %cst_34 {dimension_numbers = #tpu.dot_dimension_numbers<[1], [0], [0], [1], [0, 0, 1, 1], [], []>} : vector<2x32xf32>, vector<32x128xf32>, vector<2x128xf32> -> vector<2x128xf32>
    %107 = arith.addf %105, %106 : vector<2x128xf32>
    %108 = arith.negf %107 : vector<2x128xf32>
    %109 = math.exp %108 : vector<2x128xf32>
    %cst_35 = arith.constant 1.000000e+00 : f32
    %110 = vector.broadcast %cst_35 : f32 to vector<2x128xf32>
    %111 = arith.addf %110, %109 : vector<2x128xf32>
    %112 = arith.divf %110, %111 : vector<2x128xf32>
    %113 = math.tanh %107 : vector<2x128xf32>
    %114 = vector.extract_strided_slice %112 {offsets = [0, 0], sizes = [2, 32], strides = [1, 1]} : vector<2x128xf32> to vector<2x32xf32>
    %115 = vector.extract_strided_slice %112 {offsets = [0, 32], sizes = [2, 32], strides = [1, 1]} : vector<2x128xf32> to vector<2x32xf32>
    %116 = vector.extract_strided_slice %113 {offsets = [0, 64], sizes = [2, 32], strides = [1, 1]} : vector<2x128xf32> to vector<2x32xf32>
    %117 = vector.extract_strided_slice %112 {offsets = [0, 96], sizes = [2, 32], strides = [1, 1]} : vector<2x128xf32> to vector<2x32xf32>
    %118 = arith.mulf %115, %78 : vector<2x32xf32>
    %119 = arith.mulf %114, %116 : vector<2x32xf32>
    %120 = arith.addf %118, %119 : vector<2x32xf32>
    %121 = math.tanh %120 : vector<2x32xf32>
    %122 = arith.mulf %117, %121 : vector<2x32xf32>
    %123 = vector.extract_strided_slice %0 {offsets = [0, 3, 0], sizes = [2, 1, 4], strides = [1, 1, 1]} : vector<2x8x4xf32> to vector<2x1x4xf32>
    %124 = vector.shape_cast %123 : vector<2x1x4xf32> to vector<2x4xf32>
    %cst_36 = arith.constant dense<0.000000e+00> : vector<2x128xf32>
    %125 = tpu.matmul %124, %1, %cst_36 {dimension_numbers = #tpu.dot_dimension_numbers<[1], [0], [0], [1], [0, 0, 1, 1], [], []>} : vector<2x4xf32>, vector<4x128xf32>, vector<2x128xf32> -> vector<2x128xf32>
    %126 = vector.broadcast %3 : vector<1x128xf32> to vector<2x128xf32>
    %127 = arith.addf %125, %126 : vector<2x128xf32>
    %cst_37 = arith.constant dense<0.000000e+00> : vector<2x128xf32>
    %128 = tpu.matmul %102, %2, %cst_37 {dimension_numbers = #tpu.dot_dimension_numbers<[1], [0], [0], [1], [0, 0, 1, 1], [], []>} : vector<2x32xf32>, vector<32x128xf32>, vector<2x128xf32> -> vector<2x128xf32>
    %129 = arith.addf %127, %128 : vector<2x128xf32>
    %130 = arith.negf %129 : vector<2x128xf32>
    %131 = math.exp %130 : vector<2x128xf32>
    %cst_38 = arith.constant 1.000000e+00 : f32
    %132 = vector.broadcast %cst_38 : f32 to vector<2x128xf32>
    %133 = arith.addf %132, %131 : vector<2x128xf32>
    %134 = arith.divf %132, %133 : vector<2x128xf32>
    %135 = math.tanh %129 : vector<2x128xf32>
    %136 = vector.extract_strided_slice %134 {offsets = [0, 0], sizes = [2, 32], strides = [1, 1]} : vector<2x128xf32> to vector<2x32xf32>
    %137 = vector.extract_strided_slice %134 {offsets = [0, 32], sizes = [2, 32], strides = [1, 1]} : vector<2x128xf32> to vector<2x32xf32>
    %138 = vector.extract_strided_slice %135 {offsets = [0, 64], sizes = [2, 32], strides = [1, 1]} : vector<2x128xf32> to vector<2x32xf32>
    %139 = vector.extract_strided_slice %134 {offsets = [0, 96], sizes = [2, 32], strides = [1, 1]} : vector<2x128xf32> to vector<2x32xf32>
    %140 = arith.mulf %137, %100 : vector<2x32xf32>
    %141 = arith.mulf %136, %138 : vector<2x32xf32>
    %142 = arith.addf %140, %141 : vector<2x32xf32>
    %143 = math.tanh %142 : vector<2x32xf32>
    %144 = arith.mulf %139, %143 : vector<2x32xf32>
    %cst_39 = arith.constant dense<0.000000e+00> : vector<2x128xf32>
    %145 = tpu.matmul %102, %4, %cst_39 {dimension_numbers = #tpu.dot_dimension_numbers<[1], [0], [0], [1], [0, 0, 1, 1], [], []>} : vector<2x32xf32>, vector<32x128xf32>, vector<2x128xf32> -> vector<2x128xf32>
    %146 = vector.broadcast %6 : vector<1x128xf32> to vector<2x128xf32>
    %147 = arith.addf %145, %146 : vector<2x128xf32>
    %cst_40 = arith.constant dense<0.000000e+00> : vector<2x128xf32>
    %148 = tpu.matmul %122, %5, %cst_40 {dimension_numbers = #tpu.dot_dimension_numbers<[1], [0], [0], [1], [0, 0, 1, 1], [], []>} : vector<2x32xf32>, vector<32x128xf32>, vector<2x128xf32> -> vector<2x128xf32>
    %149 = arith.addf %147, %148 : vector<2x128xf32>
    %150 = arith.negf %149 : vector<2x128xf32>
    %151 = math.exp %150 : vector<2x128xf32>
    %cst_41 = arith.constant 1.000000e+00 : f32
    %152 = vector.broadcast %cst_41 : f32 to vector<2x128xf32>
    %153 = arith.addf %152, %151 : vector<2x128xf32>
    %154 = arith.divf %152, %153 : vector<2x128xf32>
    %155 = math.tanh %149 : vector<2x128xf32>
    %156 = vector.extract_strided_slice %154 {offsets = [0, 0], sizes = [2, 32], strides = [1, 1]} : vector<2x128xf32> to vector<2x32xf32>
    %157 = vector.extract_strided_slice %154 {offsets = [0, 32], sizes = [2, 32], strides = [1, 1]} : vector<2x128xf32> to vector<2x32xf32>
    %158 = vector.extract_strided_slice %155 {offsets = [0, 64], sizes = [2, 32], strides = [1, 1]} : vector<2x128xf32> to vector<2x32xf32>
    %159 = vector.extract_strided_slice %154 {offsets = [0, 96], sizes = [2, 32], strides = [1, 1]} : vector<2x128xf32> to vector<2x32xf32>
    %160 = arith.mulf %157, %120 : vector<2x32xf32>
    %161 = arith.mulf %156, %158 : vector<2x32xf32>
    %162 = arith.addf %160, %161 : vector<2x32xf32>
    %163 = math.tanh %162 : vector<2x32xf32>
    %164 = arith.mulf %159, %163 : vector<2x32xf32>
    %165 = vector.extract_strided_slice %0 {offsets = [0, 4, 0], sizes = [2, 1, 4], strides = [1, 1, 1]} : vector<2x8x4xf32> to vector<2x1x4xf32>
    %166 = vector.shape_cast %165 : vector<2x1x4xf32> to vector<2x4xf32>
    %cst_42 = arith.constant dense<0.000000e+00> : vector<2x128xf32>
    %167 = tpu.matmul %166, %1, %cst_42 {dimension_numbers = #tpu.dot_dimension_numbers<[1], [0], [0], [1], [0, 0, 1, 1], [], []>} : vector<2x4xf32>, vector<4x128xf32>, vector<2x128xf32> -> vector<2x128xf32>
    %168 = vector.broadcast %3 : vector<1x128xf32> to vector<2x128xf32>
    %169 = arith.addf %167, %168 : vector<2x128xf32>
    %cst_43 = arith.constant dense<0.000000e+00> : vector<2x128xf32>
    %170 = tpu.matmul %144, %2, %cst_43 {dimension_numbers = #tpu.dot_dimension_numbers<[1], [0], [0], [1], [0, 0, 1, 1], [], []>} : vector<2x32xf32>, vector<32x128xf32>, vector<2x128xf32> -> vector<2x128xf32>
    %171 = arith.addf %169, %170 : vector<2x128xf32>
    %172 = arith.negf %171 : vector<2x128xf32>
    %173 = math.exp %172 : vector<2x128xf32>
    %cst_44 = arith.constant 1.000000e+00 : f32
    %174 = vector.broadcast %cst_44 : f32 to vector<2x128xf32>
    %175 = arith.addf %174, %173 : vector<2x128xf32>
    %176 = arith.divf %174, %175 : vector<2x128xf32>
    %177 = math.tanh %171 : vector<2x128xf32>
    %178 = vector.extract_strided_slice %176 {offsets = [0, 0], sizes = [2, 32], strides = [1, 1]} : vector<2x128xf32> to vector<2x32xf32>
    %179 = vector.extract_strided_slice %176 {offsets = [0, 32], sizes = [2, 32], strides = [1, 1]} : vector<2x128xf32> to vector<2x32xf32>
    %180 = vector.extract_strided_slice %177 {offsets = [0, 64], sizes = [2, 32], strides = [1, 1]} : vector<2x128xf32> to vector<2x32xf32>
    %181 = vector.extract_strided_slice %176 {offsets = [0, 96], sizes = [2, 32], strides = [1, 1]} : vector<2x128xf32> to vector<2x32xf32>
    %182 = arith.mulf %179, %142 : vector<2x32xf32>
    %183 = arith.mulf %178, %180 : vector<2x32xf32>
    %184 = arith.addf %182, %183 : vector<2x32xf32>
    %185 = math.tanh %184 : vector<2x32xf32>
    %186 = arith.mulf %181, %185 : vector<2x32xf32>
    %cst_45 = arith.constant dense<0.000000e+00> : vector<2x128xf32>
    %187 = tpu.matmul %144, %4, %cst_45 {dimension_numbers = #tpu.dot_dimension_numbers<[1], [0], [0], [1], [0, 0, 1, 1], [], []>} : vector<2x32xf32>, vector<32x128xf32>, vector<2x128xf32> -> vector<2x128xf32>
    %188 = vector.broadcast %6 : vector<1x128xf32> to vector<2x128xf32>
    %189 = arith.addf %187, %188 : vector<2x128xf32>
    %cst_46 = arith.constant dense<0.000000e+00> : vector<2x128xf32>
    %190 = tpu.matmul %164, %5, %cst_46 {dimension_numbers = #tpu.dot_dimension_numbers<[1], [0], [0], [1], [0, 0, 1, 1], [], []>} : vector<2x32xf32>, vector<32x128xf32>, vector<2x128xf32> -> vector<2x128xf32>
    %191 = arith.addf %189, %190 : vector<2x128xf32>
    %192 = arith.negf %191 : vector<2x128xf32>
    %193 = math.exp %192 : vector<2x128xf32>
    %cst_47 = arith.constant 1.000000e+00 : f32
    %194 = vector.broadcast %cst_47 : f32 to vector<2x128xf32>
    %195 = arith.addf %194, %193 : vector<2x128xf32>
    %196 = arith.divf %194, %195 : vector<2x128xf32>
    %197 = math.tanh %191 : vector<2x128xf32>
    %198 = vector.extract_strided_slice %196 {offsets = [0, 0], sizes = [2, 32], strides = [1, 1]} : vector<2x128xf32> to vector<2x32xf32>
    %199 = vector.extract_strided_slice %196 {offsets = [0, 32], sizes = [2, 32], strides = [1, 1]} : vector<2x128xf32> to vector<2x32xf32>
    %200 = vector.extract_strided_slice %197 {offsets = [0, 64], sizes = [2, 32], strides = [1, 1]} : vector<2x128xf32> to vector<2x32xf32>
    %201 = vector.extract_strided_slice %196 {offsets = [0, 96], sizes = [2, 32], strides = [1, 1]} : vector<2x128xf32> to vector<2x32xf32>
    %202 = arith.mulf %199, %162 : vector<2x32xf32>
    %203 = arith.mulf %198, %200 : vector<2x32xf32>
    %204 = arith.addf %202, %203 : vector<2x32xf32>
    %205 = math.tanh %204 : vector<2x32xf32>
    %206 = arith.mulf %201, %205 : vector<2x32xf32>
    %207 = vector.extract_strided_slice %0 {offsets = [0, 5, 0], sizes = [2, 1, 4], strides = [1, 1, 1]} : vector<2x8x4xf32> to vector<2x1x4xf32>
    %208 = vector.shape_cast %207 : vector<2x1x4xf32> to vector<2x4xf32>
    %cst_48 = arith.constant dense<0.000000e+00> : vector<2x128xf32>
    %209 = tpu.matmul %208, %1, %cst_48 {dimension_numbers = #tpu.dot_dimension_numbers<[1], [0], [0], [1], [0, 0, 1, 1], [], []>} : vector<2x4xf32>, vector<4x128xf32>, vector<2x128xf32> -> vector<2x128xf32>
    %210 = vector.broadcast %3 : vector<1x128xf32> to vector<2x128xf32>
    %211 = arith.addf %209, %210 : vector<2x128xf32>
    %cst_49 = arith.constant dense<0.000000e+00> : vector<2x128xf32>
    %212 = tpu.matmul %186, %2, %cst_49 {dimension_numbers = #tpu.dot_dimension_numbers<[1], [0], [0], [1], [0, 0, 1, 1], [], []>} : vector<2x32xf32>, vector<32x128xf32>, vector<2x128xf32> -> vector<2x128xf32>
    %213 = arith.addf %211, %212 : vector<2x128xf32>
    %214 = arith.negf %213 : vector<2x128xf32>
    %215 = math.exp %214 : vector<2x128xf32>
    %cst_50 = arith.constant 1.000000e+00 : f32
    %216 = vector.broadcast %cst_50 : f32 to vector<2x128xf32>
    %217 = arith.addf %216, %215 : vector<2x128xf32>
    %218 = arith.divf %216, %217 : vector<2x128xf32>
    %219 = math.tanh %213 : vector<2x128xf32>
    %220 = vector.extract_strided_slice %218 {offsets = [0, 0], sizes = [2, 32], strides = [1, 1]} : vector<2x128xf32> to vector<2x32xf32>
    %221 = vector.extract_strided_slice %218 {offsets = [0, 32], sizes = [2, 32], strides = [1, 1]} : vector<2x128xf32> to vector<2x32xf32>
    %222 = vector.extract_strided_slice %219 {offsets = [0, 64], sizes = [2, 32], strides = [1, 1]} : vector<2x128xf32> to vector<2x32xf32>
    %223 = vector.extract_strided_slice %218 {offsets = [0, 96], sizes = [2, 32], strides = [1, 1]} : vector<2x128xf32> to vector<2x32xf32>
    %224 = arith.mulf %221, %184 : vector<2x32xf32>
    %225 = arith.mulf %220, %222 : vector<2x32xf32>
    %226 = arith.addf %224, %225 : vector<2x32xf32>
    %227 = math.tanh %226 : vector<2x32xf32>
    %228 = arith.mulf %223, %227 : vector<2x32xf32>
    %cst_51 = arith.constant dense<0.000000e+00> : vector<2x128xf32>
    %229 = tpu.matmul %186, %4, %cst_51 {dimension_numbers = #tpu.dot_dimension_numbers<[1], [0], [0], [1], [0, 0, 1, 1], [], []>} : vector<2x32xf32>, vector<32x128xf32>, vector<2x128xf32> -> vector<2x128xf32>
    %230 = vector.broadcast %6 : vector<1x128xf32> to vector<2x128xf32>
    %231 = arith.addf %229, %230 : vector<2x128xf32>
    %cst_52 = arith.constant dense<0.000000e+00> : vector<2x128xf32>
    %232 = tpu.matmul %206, %5, %cst_52 {dimension_numbers = #tpu.dot_dimension_numbers<[1], [0], [0], [1], [0, 0, 1, 1], [], []>} : vector<2x32xf32>, vector<32x128xf32>, vector<2x128xf32> -> vector<2x128xf32>
    %233 = arith.addf %231, %232 : vector<2x128xf32>
    %234 = arith.negf %233 : vector<2x128xf32>
    %235 = math.exp %234 : vector<2x128xf32>
    %cst_53 = arith.constant 1.000000e+00 : f32
    %236 = vector.broadcast %cst_53 : f32 to vector<2x128xf32>
    %237 = arith.addf %236, %235 : vector<2x128xf32>
    %238 = arith.divf %236, %237 : vector<2x128xf32>
    %239 = math.tanh %233 : vector<2x128xf32>
    %240 = vector.extract_strided_slice %238 {offsets = [0, 0], sizes = [2, 32], strides = [1, 1]} : vector<2x128xf32> to vector<2x32xf32>
    %241 = vector.extract_strided_slice %238 {offsets = [0, 32], sizes = [2, 32], strides = [1, 1]} : vector<2x128xf32> to vector<2x32xf32>
    %242 = vector.extract_strided_slice %239 {offsets = [0, 64], sizes = [2, 32], strides = [1, 1]} : vector<2x128xf32> to vector<2x32xf32>
    %243 = vector.extract_strided_slice %238 {offsets = [0, 96], sizes = [2, 32], strides = [1, 1]} : vector<2x128xf32> to vector<2x32xf32>
    %244 = arith.mulf %241, %204 : vector<2x32xf32>
    %245 = arith.mulf %240, %242 : vector<2x32xf32>
    %246 = arith.addf %244, %245 : vector<2x32xf32>
    %247 = math.tanh %246 : vector<2x32xf32>
    %248 = arith.mulf %243, %247 : vector<2x32xf32>
    %249 = vector.extract_strided_slice %0 {offsets = [0, 6, 0], sizes = [2, 1, 4], strides = [1, 1, 1]} : vector<2x8x4xf32> to vector<2x1x4xf32>
    %250 = vector.shape_cast %249 : vector<2x1x4xf32> to vector<2x4xf32>
    %cst_54 = arith.constant dense<0.000000e+00> : vector<2x128xf32>
    %251 = tpu.matmul %250, %1, %cst_54 {dimension_numbers = #tpu.dot_dimension_numbers<[1], [0], [0], [1], [0, 0, 1, 1], [], []>} : vector<2x4xf32>, vector<4x128xf32>, vector<2x128xf32> -> vector<2x128xf32>
    %252 = vector.broadcast %3 : vector<1x128xf32> to vector<2x128xf32>
    %253 = arith.addf %251, %252 : vector<2x128xf32>
    %cst_55 = arith.constant dense<0.000000e+00> : vector<2x128xf32>
    %254 = tpu.matmul %228, %2, %cst_55 {dimension_numbers = #tpu.dot_dimension_numbers<[1], [0], [0], [1], [0, 0, 1, 1], [], []>} : vector<2x32xf32>, vector<32x128xf32>, vector<2x128xf32> -> vector<2x128xf32>
    %255 = arith.addf %253, %254 : vector<2x128xf32>
    %256 = arith.negf %255 : vector<2x128xf32>
    %257 = math.exp %256 : vector<2x128xf32>
    %cst_56 = arith.constant 1.000000e+00 : f32
    %258 = vector.broadcast %cst_56 : f32 to vector<2x128xf32>
    %259 = arith.addf %258, %257 : vector<2x128xf32>
    %260 = arith.divf %258, %259 : vector<2x128xf32>
    %261 = math.tanh %255 : vector<2x128xf32>
    %262 = vector.extract_strided_slice %260 {offsets = [0, 0], sizes = [2, 32], strides = [1, 1]} : vector<2x128xf32> to vector<2x32xf32>
    %263 = vector.extract_strided_slice %260 {offsets = [0, 32], sizes = [2, 32], strides = [1, 1]} : vector<2x128xf32> to vector<2x32xf32>
    %264 = vector.extract_strided_slice %261 {offsets = [0, 64], sizes = [2, 32], strides = [1, 1]} : vector<2x128xf32> to vector<2x32xf32>
    %265 = vector.extract_strided_slice %260 {offsets = [0, 96], sizes = [2, 32], strides = [1, 1]} : vector<2x128xf32> to vector<2x32xf32>
    %266 = arith.mulf %263, %226 : vector<2x32xf32>
    %267 = arith.mulf %262, %264 : vector<2x32xf32>
    %268 = arith.addf %266, %267 : vector<2x32xf32>
    %269 = math.tanh %268 : vector<2x32xf32>
    %270 = arith.mulf %265, %269 : vector<2x32xf32>
    %cst_57 = arith.constant dense<0.000000e+00> : vector<2x128xf32>
    %271 = tpu.matmul %228, %4, %cst_57 {dimension_numbers = #tpu.dot_dimension_numbers<[1], [0], [0], [1], [0, 0, 1, 1], [], []>} : vector<2x32xf32>, vector<32x128xf32>, vector<2x128xf32> -> vector<2x128xf32>
    %272 = vector.broadcast %6 : vector<1x128xf32> to vector<2x128xf32>
    %273 = arith.addf %271, %272 : vector<2x128xf32>
    %cst_58 = arith.constant dense<0.000000e+00> : vector<2x128xf32>
    %274 = tpu.matmul %248, %5, %cst_58 {dimension_numbers = #tpu.dot_dimension_numbers<[1], [0], [0], [1], [0, 0, 1, 1], [], []>} : vector<2x32xf32>, vector<32x128xf32>, vector<2x128xf32> -> vector<2x128xf32>
    %275 = arith.addf %273, %274 : vector<2x128xf32>
    %276 = arith.negf %275 : vector<2x128xf32>
    %277 = math.exp %276 : vector<2x128xf32>
    %cst_59 = arith.constant 1.000000e+00 : f32
    %278 = vector.broadcast %cst_59 : f32 to vector<2x128xf32>
    %279 = arith.addf %278, %277 : vector<2x128xf32>
    %280 = arith.divf %278, %279 : vector<2x128xf32>
    %281 = math.tanh %275 : vector<2x128xf32>
    %282 = vector.extract_strided_slice %280 {offsets = [0, 0], sizes = [2, 32], strides = [1, 1]} : vector<2x128xf32> to vector<2x32xf32>
    %283 = vector.extract_strided_slice %280 {offsets = [0, 32], sizes = [2, 32], strides = [1, 1]} : vector<2x128xf32> to vector<2x32xf32>
    %284 = vector.extract_strided_slice %281 {offsets = [0, 64], sizes = [2, 32], strides = [1, 1]} : vector<2x128xf32> to vector<2x32xf32>
    %285 = vector.extract_strided_slice %280 {offsets = [0, 96], sizes = [2, 32], strides = [1, 1]} : vector<2x128xf32> to vector<2x32xf32>
    %286 = arith.mulf %283, %246 : vector<2x32xf32>
    %287 = arith.mulf %282, %284 : vector<2x32xf32>
    %288 = arith.addf %286, %287 : vector<2x32xf32>
    %289 = math.tanh %288 : vector<2x32xf32>
    %290 = arith.mulf %285, %289 : vector<2x32xf32>
    %291 = vector.extract_strided_slice %0 {offsets = [0, 7, 0], sizes = [2, 1, 4], strides = [1, 1, 1]} : vector<2x8x4xf32> to vector<2x1x4xf32>
    %292 = vector.shape_cast %291 : vector<2x1x4xf32> to vector<2x4xf32>
    %cst_60 = arith.constant dense<0.000000e+00> : vector<2x128xf32>
    %293 = tpu.matmul %292, %1, %cst_60 {dimension_numbers = #tpu.dot_dimension_numbers<[1], [0], [0], [1], [0, 0, 1, 1], [], []>} : vector<2x4xf32>, vector<4x128xf32>, vector<2x128xf32> -> vector<2x128xf32>
    %294 = vector.broadcast %3 : vector<1x128xf32> to vector<2x128xf32>
    %295 = arith.addf %293, %294 : vector<2x128xf32>
    %cst_61 = arith.constant dense<0.000000e+00> : vector<2x128xf32>
    %296 = tpu.matmul %270, %2, %cst_61 {dimension_numbers = #tpu.dot_dimension_numbers<[1], [0], [0], [1], [0, 0, 1, 1], [], []>} : vector<2x32xf32>, vector<32x128xf32>, vector<2x128xf32> -> vector<2x128xf32>
    %297 = arith.addf %295, %296 : vector<2x128xf32>
    %298 = arith.negf %297 : vector<2x128xf32>
    %299 = math.exp %298 : vector<2x128xf32>
    %cst_62 = arith.constant 1.000000e+00 : f32
    %300 = vector.broadcast %cst_62 : f32 to vector<2x128xf32>
    %301 = arith.addf %300, %299 : vector<2x128xf32>
    %302 = arith.divf %300, %301 : vector<2x128xf32>
    %303 = math.tanh %297 : vector<2x128xf32>
    %304 = vector.extract_strided_slice %302 {offsets = [0, 0], sizes = [2, 32], strides = [1, 1]} : vector<2x128xf32> to vector<2x32xf32>
    %305 = vector.extract_strided_slice %302 {offsets = [0, 32], sizes = [2, 32], strides = [1, 1]} : vector<2x128xf32> to vector<2x32xf32>
    %306 = vector.extract_strided_slice %303 {offsets = [0, 64], sizes = [2, 32], strides = [1, 1]} : vector<2x128xf32> to vector<2x32xf32>
    %307 = vector.extract_strided_slice %302 {offsets = [0, 96], sizes = [2, 32], strides = [1, 1]} : vector<2x128xf32> to vector<2x32xf32>
    %308 = arith.mulf %305, %268 : vector<2x32xf32>
    %309 = arith.mulf %304, %306 : vector<2x32xf32>
    %310 = arith.addf %308, %309 : vector<2x32xf32>
    %311 = math.tanh %310 : vector<2x32xf32>
    %312 = arith.mulf %307, %311 : vector<2x32xf32>
    %cst_63 = arith.constant dense<0.000000e+00> : vector<2x128xf32>
    %313 = tpu.matmul %270, %4, %cst_63 {dimension_numbers = #tpu.dot_dimension_numbers<[1], [0], [0], [1], [0, 0, 1, 1], [], []>} : vector<2x32xf32>, vector<32x128xf32>, vector<2x128xf32> -> vector<2x128xf32>
    %314 = vector.broadcast %6 : vector<1x128xf32> to vector<2x128xf32>
    %315 = arith.addf %313, %314 : vector<2x128xf32>
    %cst_64 = arith.constant dense<0.000000e+00> : vector<2x128xf32>
    %316 = tpu.matmul %290, %5, %cst_64 {dimension_numbers = #tpu.dot_dimension_numbers<[1], [0], [0], [1], [0, 0, 1, 1], [], []>} : vector<2x32xf32>, vector<32x128xf32>, vector<2x128xf32> -> vector<2x128xf32>
    %317 = arith.addf %315, %316 : vector<2x128xf32>
    %318 = arith.negf %317 : vector<2x128xf32>
    %319 = math.exp %318 : vector<2x128xf32>
    %cst_65 = arith.constant 1.000000e+00 : f32
    %320 = vector.broadcast %cst_65 : f32 to vector<2x128xf32>
    %321 = arith.addf %320, %319 : vector<2x128xf32>
    %322 = arith.divf %320, %321 : vector<2x128xf32>
    %323 = math.tanh %317 : vector<2x128xf32>
    %324 = vector.extract_strided_slice %322 {offsets = [0, 0], sizes = [2, 32], strides = [1, 1]} : vector<2x128xf32> to vector<2x32xf32>
    %325 = vector.extract_strided_slice %322 {offsets = [0, 32], sizes = [2, 32], strides = [1, 1]} : vector<2x128xf32> to vector<2x32xf32>
    %326 = vector.extract_strided_slice %323 {offsets = [0, 64], sizes = [2, 32], strides = [1, 1]} : vector<2x128xf32> to vector<2x32xf32>
    %327 = vector.extract_strided_slice %322 {offsets = [0, 96], sizes = [2, 32], strides = [1, 1]} : vector<2x128xf32> to vector<2x32xf32>
    %328 = arith.mulf %325, %288 : vector<2x32xf32>
    %329 = arith.mulf %324, %326 : vector<2x32xf32>
    %330 = arith.addf %328, %329 : vector<2x32xf32>
    %331 = math.tanh %330 : vector<2x32xf32>
    %332 = arith.mulf %327, %331 : vector<2x32xf32>
    %cst_66 = arith.constant dense<0.000000e+00> : vector<2x128xf32>
    %333 = tpu.matmul %312, %4, %cst_66 {dimension_numbers = #tpu.dot_dimension_numbers<[1], [0], [0], [1], [0, 0, 1, 1], [], []>} : vector<2x32xf32>, vector<32x128xf32>, vector<2x128xf32> -> vector<2x128xf32>
    %334 = vector.broadcast %6 : vector<1x128xf32> to vector<2x128xf32>
    %335 = arith.addf %333, %334 : vector<2x128xf32>
    %cst_67 = arith.constant dense<0.000000e+00> : vector<2x128xf32>
    %336 = tpu.matmul %332, %5, %cst_67 {dimension_numbers = #tpu.dot_dimension_numbers<[1], [0], [0], [1], [0, 0, 1, 1], [], []>} : vector<2x32xf32>, vector<32x128xf32>, vector<2x128xf32> -> vector<2x128xf32>
    %337 = arith.addf %335, %336 : vector<2x128xf32>
    %338 = arith.negf %337 : vector<2x128xf32>
    %339 = math.exp %338 : vector<2x128xf32>
    %cst_68 = arith.constant 1.000000e+00 : f32
    %340 = vector.broadcast %cst_68 : f32 to vector<2x128xf32>
    %341 = arith.addf %340, %339 : vector<2x128xf32>
    %342 = arith.divf %340, %341 : vector<2x128xf32>
    %343 = math.tanh %337 : vector<2x128xf32>
    %344 = vector.extract_strided_slice %342 {offsets = [0, 0], sizes = [2, 32], strides = [1, 1]} : vector<2x128xf32> to vector<2x32xf32>
    %345 = vector.extract_strided_slice %342 {offsets = [0, 32], sizes = [2, 32], strides = [1, 1]} : vector<2x128xf32> to vector<2x32xf32>
    %346 = vector.extract_strided_slice %343 {offsets = [0, 64], sizes = [2, 32], strides = [1, 1]} : vector<2x128xf32> to vector<2x32xf32>
    %347 = vector.extract_strided_slice %342 {offsets = [0, 96], sizes = [2, 32], strides = [1, 1]} : vector<2x128xf32> to vector<2x32xf32>
    %348 = arith.mulf %345, %330 : vector<2x32xf32>
    %349 = arith.mulf %344, %346 : vector<2x32xf32>
    %350 = arith.addf %348, %349 : vector<2x32xf32>
    %351 = math.tanh %350 : vector<2x32xf32>
    %352 = arith.mulf %347, %351 : vector<2x32xf32>
    %c0_69 = arith.constant 0 : index
    %c0_70 = arith.constant 0 : index
    %c0_71 = arith.constant 0 : index
    %353 = vector.load %arg5[%c0_69, %c0_70, %c0_71] : memref<2x2x32xf32, #tpu.memory_space<vmem>>, vector<1x2x32xf32>
    %354 = vector.shape_cast %353 : vector<1x2x32xf32> to vector<2x32xf32>
    %355 = vector.shape_cast %312 : vector<2x32xf32> to vector<1x2x32xf32>
    tpu.vector_store %arg5[%c0_69, %c0_70, %c0_71], %355 {strides = array<i32>} : memref<2x2x32xf32, #tpu.memory_space<vmem>>, vector<1x2x32xf32>,
    %c0_72 = arith.constant 0 : index
    %c0_73 = arith.constant 0 : index
    %c0_74 = arith.constant 0 : index
    %356 = vector.load %arg6[%c0_72, %c0_73, %c0_74] : memref<2x2x32xf32, #tpu.memory_space<vmem>>, vector<1x2x32xf32>
    %357 = vector.shape_cast %356 : vector<1x2x32xf32> to vector<2x32xf32>
    %358 = vector.shape_cast %310 : vector<2x32xf32> to vector<1x2x32xf32>
    tpu.vector_store %arg6[%c0_72, %c0_73, %c0_74], %358 {strides = array<i32>} : memref<2x2x32xf32, #tpu.memory_space<vmem>>, vector<1x2x32xf32>,
    %c1_75 = arith.constant 1 : index
    %c0_76 = arith.constant 0 : index
    %c0_77 = arith.constant 0 : index
    %359 = vector.load %arg5[%c1_75, %c0_76, %c0_77] : memref<2x2x32xf32, #tpu.memory_space<vmem>>, vector<1x2x32xf32>
    %360 = vector.shape_cast %359 : vector<1x2x32xf32> to vector<2x32xf32>
    %361 = vector.shape_cast %352 : vector<2x32xf32> to vector<1x2x32xf32>
    tpu.vector_store %arg5[%c1_75, %c0_76, %c0_77], %361 {strides = array<i32>} : memref<2x2x32xf32, #tpu.memory_space<vmem>>, vector<1x2x32xf32>,
    %c1_78 = arith.constant 1 : index
    %c0_79 = arith.constant 0 : index
    %c0_80 = arith.constant 0 : index
    %362 = vector.load %arg6[%c1_78, %c0_79, %c0_80] : memref<2x2x32xf32, #tpu.memory_space<vmem>>, vector<1x2x32xf32>
    %363 = vector.shape_cast %362 : vector<1x2x32xf32> to vector<2x32xf32>
    %364 = vector.shape_cast %350 : vector<2x32xf32> to vector<1x2x32xf32>
    tpu.vector_store %arg6[%c1_78, %c0_79, %c0_80], %364 {strides = array<i32>} : memref<2x2x32xf32, #tpu.memory_space<vmem>>, vector<1x2x32xf32>,
    %cst_81 = arith.constant dense<0.000000e+00> : vector<2x128xf32>
    %365 = tpu.matmul %352, %7, %cst_81 {dimension_numbers = #tpu.dot_dimension_numbers<[1], [0], [0], [1], [0, 0, 1, 1], [], []>} : vector<2x32xf32>, vector<32x128xf32>, vector<2x128xf32> -> vector<2x128xf32>
    %366 = vector.broadcast %8 : vector<1x128xf32> to vector<2x128xf32>
    %367 = arith.addf %365, %366 : vector<2x128xf32>
    %368 = vector.extract_strided_slice %367 {offsets = [0, 0], sizes = [2, 3], strides = [1, 1]} : vector<2x128xf32> to vector<2x3xf32>
    %c0_82 = arith.constant 0 : index
    %c0_83 = arith.constant 0 : index
    %369 = vector.load %arg4[%c0_82, %c0_83] : memref<2x3xf32, #tpu.memory_space<vmem>>, vector<2x3xf32>
    tpu.vector_store %arg4[%c0_82, %c0_83], %368 {strides = array<i32>} : memref<2x3xf32, #tpu.memory_space<vmem>>, vector<2x3xf32>,
    return
  }
}

</mosaic_0001>

<bundles_post_ra>
// kernel: lstm_forward.1
= control target key start
LH: loop header
LB: loop body
LE: loop exit
PB: predicated region body
PF: predicated region fallthrough
CT: control target
= control target key end

     0   :  { %12 = vsyncpa [#allocation3], 0  ;;  %s4574_s0 = inlined_call_operand.vmem [shape: f32[2,8,4], index: 0, kind: input, shape index: {}]   ;;  %s4575_s1 = inlined_call_operand.hbm [shape: f32[2,2,32], index: 1, kind: input, shape index: {}, may-alias: {1,5}]   ;;  %s4576_s2 = inlined_call_operand.hbm [shape: f32[2,2,32], index: 2, kind: input, shape index: {}, may-alias: {2,6}]   ;;  %s4577_s3 = inlined_call_operand.hbm [shape: f32[160,128], index: 3, kind: input, shape index: {}]   ;;  %s4578_s4 = inlined_call_operand.hbm [shape: f32[2,3], index: 4, kind: output, shape index: {0}]   ;;  %s4579_s5 = inlined_call_operand.hbm [shape: f32[2,2,32], index: 5, kind: output, shape index: {1}, may-alias: {1,5}]   ;;  %s4580_s6 = inlined_call_operand.hbm [shape: f32[2,2,32], index: 6, kind: output, shape index: {2}, may-alias: {2,6}]  }
   0x1   :  { %13 = vsyncpa [#allocation6], 0 }
   0x2   :  { %14 = vsyncpa [#allocation4], 0 }
   0x3   :  { %15 = vsyncpa [#allocation10], 0  ;;  %s4019_s21 = smov [#allocation5]   ;;  %s4020_s23 = smov [#allocation2]  }
   0x4   :  { %s35_s22 = sshll.u32 %s4019_s21, 4  ;;  %s23_s24 = sshll.u32 %s4020_s23, 4  ;;  %s36_s22 = int_to_ptr.vmem [resolvable:$true] %s35_s22  ;;  %s4069_s24 = int_to_ptr.vmem [resolvable:$true] %s23_s24 }
   0x5   :  { %s3879_s27 = scalar_lea.hbm %s4576_s2, 64 }
   0x6   :  { %p3880_p0 = scmp.ne.s32.totalorder %s4576_s2, %s3879_s27  ;;  %p3883_p1 = scmp.lt.u32.totalorder %s3879_s27, %s4576_s2 }
   0x8   :  { %p3885_p2 = pnand %p3883_p1, %p3880_p0 }
   0xa   :  { %3888 = shalt.err (!%p3885_p2)
}
   0xb   :  { %s3889_s8 = scalar_lea.vmem %s36_s22, 64  ;;  %p3894_p4 = scmp.lt.s32.totalorder %s36_s22, %s36_s22 }
   0xc   :  { %p3890_p3 = scmp.ne.s32.totalorder %s36_s22, %s3889_s8  ;;  %p3895_p5 = scmp.lt.s32.totalorder %s3889_s8, %s3889_s8 }
   0xe   :  { %p3896_p6 = por %p3895_p5, %p3894_p4 }
  0x10   :  { %p3897_p7 = pnand %p3896_p6, %p3890_p3 }
  0x12   :  { %3900 = shalt.err (!%p3897_p7)
}
  0x13   :  { %s4021_s9 = smov 32   ;;  %s4022_s10 = smov 2  }
  0x14   :  { %41 = dma.hbm_to_vmem [thread:$0]  %s4576_s2, 64, %s36_s22, [#allocation6], %s4021_s9, %s4021_s9, %s4022_s10  }
  0x15   :  { %s3901_s15 = scalar_lea.hbm %s4575_s1, 64 }
  0x16   :  { %p3902_p8 = scmp.ne.s32.totalorder %s4575_s1, %s3901_s15  ;;  %p3905_p9 = scmp.lt.u32.totalorder %s3901_s15, %s4575_s1 }
  0x18   :  { %p3907_p10 = pnand %p3905_p9, %p3902_p8 }
  0x1a   :  { %3910 = shalt.err (!%p3907_p10)
}
  0x1b   :  { %s3911_s20 = scalar_lea.vmem %s4069_s24, 64  ;;  %p3916_p12 = scmp.lt.s32.totalorder %s4069_s24, %s4069_s24 }
  0x1c   :  { %p3912_p11 = scmp.ne.s32.totalorder %s4069_s24, %s3911_s20  ;;  %p3917_p13 = scmp.lt.s32.totalorder %s3911_s20, %s3911_s20 }
  0x1e   :  { %p3918_p0 = por %p3917_p13, %p3916_p12 }
  0x20   :  { %p3919_p1 = pnand %p3918_p0, %p3912_p11 }
  0x22   :  { %3922 = shalt.err (!%p3919_p1)
}
  0x23   :  { %29 = dma.hbm_to_vmem [thread:$0]  %s4575_s1, 64, %s4069_s24, [#allocation3], %s4021_s9, %s4021_s9, %s4022_s10  }
  0x24   :  { %s4023_s22 = smov [#allocation7]   ;;  %s3923_s27 = scalar_lea.hbm %s4577_s3, 2560 }
  0x25   :  { %s47_s23 = sshll.u32 %s4023_s22, 4  ;;  %p3924_p2 = scmp.ne.s32.totalorder %s4577_s3, %s3923_s27  ;;  %s48_s23 = int_to_ptr.vmem [resolvable:$true] %s47_s23 }
  0x26   :  { %p3927_p3 = scmp.lt.u32.totalorder %s3923_s27, %s4577_s3 }
  0x28   :  { %p3929_p4 = pnand %p3927_p3, %p3924_p2 }
  0x2a   :  { %3932 = shalt.err (!%p3929_p4)
}
  0x2b   :  { %s3933_s8 = scalar_lea.vmem %s48_s23, 2560  ;;  %p3938_p6 = scmp.lt.s32.totalorder %s48_s23, %s48_s23 }
  0x2c   :  { %p3934_p5 = scmp.ne.s32.totalorder %s48_s23, %s3933_s8  ;;  %p3939_p7 = scmp.lt.s32.totalorder %s3933_s8, %s3933_s8 }
  0x2e   :  { %p3940_p8 = por %p3939_p7, %p3938_p6 }
  0x30   :  { %p3941_p9 = pnand %p3940_p8, %p3934_p5 }
  0x32   :  { %3944 = shalt.err (!%p3941_p9)
}
  0x33   :  { %s4024_s1 = smov 128   ;;  %s4025_s24 = smov 8  }
  0x34   :  { %53 = dma.hbm_to_vmem [thread:$0]  %s4577_s3, 2560, %s48_s23, [#allocation6], %s4024_s1, %s4024_s1, %s4025_s24  }
  0x35   :  { %4011 = dma.done.wait [#allocation3], 64  }
  0x36   :  { %4012 = vsyncadd [#allocation3], 4294967232 }
  0x37   :  { %4013 = dma.done.wait [#allocation6], 2624  }
  0x38   :  { %4014 = vsyncadd [#allocation6], 4294964672  ;;  %v4026_v0 = vmov 0.0   ;;  %vm4027_vm0 = vmmov 0   ;;  %vm103_vm1 = vcmask 1043456   ;;  %v4129_v2 = vld [vmem:[%s4574_s0] sm:$0xff] }
  0x39   :  { %3221 = vmatprep.subr.mxu0 %v4026_v0  ;;  %3223 = vmatprep.mubr.msk.f32.mxu0 %vm4027_vm0, %v4026_v0  ;;  %v4124_v1 = vld [vmem:[#allocation7] sm:$0xf]  ;;  %v4134_v3 = vld [vmem:[%s4574_s0 + $0x8] sm:$0xff]  ;;  %vm98_vm2 = vcmask 1041409   ;;  %vm100_vm3 = vcmask 31744   ;;  %v66_v5 = vld [vmem:[#allocation7 + $0x8] sm:$0xff] }
  0x3a   :  { %3237 = vmatprep.subr.mxu1 %v4026_v0  ;;  %3239 = vmatprep.mubr.msk.f32.mxu1 %vm4027_vm0, %v4026_v0  ;;  %v97_v4 = vrot.slane %v4134_v3, 7  ;;  %v67_v6 = vld [vmem:[#allocation7 + $0x10] sm:$0xff]  ;;  %v4028_v7 = vmov 0.0|0.0   ;;  %v68_v9 = vld [vmem:[#allocation7 + $0x18] sm:$0xff]  ;;  %v69_v10 = vld [vmem:[#allocation7 + $0x20] sm:$0xff]  ;;  %vm177_vm4 = vcmask 261120  }
  0x3b   :  { %3222 = vmatpush3.msk.msra.mxu0 %vm103_vm1, %v4124_v1  ;;  %3238 = vmatpush3.msk.msra.mxu1 %vm103_vm1, %v4124_v1  ;;  %v4142_v8 = vpack.c.bf16 %v67_v6, %v66_v5  ;;  %v4149_v12 = vpack.c.bf16 %v69_v10, %v68_v9  ;;  %v85_v13 = vld [vmem:[#allocation2] sm:$0x3]  ;;  %v4159_v14 = vld [vmem:[#allocation7 + $0x28] ss:$0 sm:$0xff]  ;;  %s4029_s16 = smov 64   ;;  %v280_v30 = vrot.slane %v4129_v2, 1 }
  0x3c   :  { %3536 = vmatprep.subr.bf16.mxu0 %v4028_v7  ;;  %3542 = vmatprep.subr.bf16.mxu1 %v4028_v7  ;;  %v99_v11 = vsel %vm98_vm2, %v97_v4, %v4129_v2  ;;  %v88_v19 = vld [vmem:[#allocation5] sm:$0x3]  ;;  %v71_v31 = vld [vmem:[#allocation7 + $0x30] sm:$0xff]  ;;  %v73_v33 = vld [vmem:[#allocation7 + $0x40] sm:$0xff]  ;;  %vm2876_vm5 = vcmask 254976   ;;  %s4031_s2 = smov [#allocation9]  }
  0x3d   :  { %3224 = vmatmul.mubr.msk.f32.vlgmr.msra.gmra.mrb[0].mxu0 %vm100_vm3, %v99_v11  ;;  %v72_v32 = vld [vmem:[#allocation7 + $0x38] sm:$0xff]  ;;  %v74_v35 = vld [vmem:[#allocation7 + $0x48] sm:$0xff]  ;;  %v281_v36 = vsel %vm98_vm2, %v4134_v3, %v280_v30  ;;  %v75_v41 = vld [vmem:[#allocation7 + $0x50] sm:$0xff]  ;;  %s2988_s21 = sshll.u32 %s4031_s2, 4  ;;  %s2989_s21 = int_to_ptr.vmem [resolvable:$true] %s2988_s21 }
  0x3e   :  { %3538 = vmatpush3.bf16.msra.mxu0 %v4142_v8  ;;  %3234 = vmatprep.mubr.msk.f32.mxu0 %vm4027_vm0, %v4026_v0  ;;  %v4169_v34 = vpack.c.bf16 %v72_v32, %v71_v31  ;;  %v4175_v37 = vpack.c.bf16 %v74_v35, %v73_v33  ;;  %v76_v42 = vld [vmem:[#allocation7 + $0x58] sm:$0xff]  ;;  %v77_v44 = vld [vmem:[#allocation7 + $0x60] sm:$0xff]  ;;  %v78_v45 = vld [vmem:[#allocation7 + $0x68] sm:$0xff]  ;;  %s3945_s22 = scalar_lea.vmem %s2989_s21, 64  ;;  %p3950_p11 = scmp.lt.s32.totalorder %s2989_s21, %s2989_s21 }
  0x3f   :  { %3539 = vmatprep.subr.bf16.mxu0 %v4028_v7  ;;  %3240 = vmatmul.mubr.msk.f32.vlgmr.msra.gmra.mrb[0].mxu1 %vm100_vm3, %v281_v36  ;;  %v4188_v43 = vpack.c.bf16 %v76_v42, %v75_v41  ;;  %v4193_v47 = vpack.c.bf16 %v78_v45, %v77_v44  ;;  %v87_v48 = vld [vmem:[#allocation2 + $0x2] sm:$0x3]  ;;  %v4213_v52 = vld [vmem:[#allocation7 + $0x70] ss:$0 sm:$0xff]  ;;  %v90_v58 = vld [vmem:[#allocation5 + $0x2] sm:$0x3]  ;;  %p3946_p10 = scmp.ne.s32.totalorder %s2989_s21, %s3945_s22  ;;  %p3951_p12 = scmp.lt.s32.totalorder %s3945_s22, %s3945_s22 }
  0x40   :  { %3544 = vmatpush3.bf16.msra.mxu1 %v4142_v8  ;;  %3250 = vmatprep.mubr.msk.f32.mxu1 %vm4027_vm0, %v4026_v0 }
  0x41   :  { %3545 = vmatprep.subr.bf16.mxu1 %v4028_v7  ;;  %p3952_p13 = por %p3951_p12, %p3950_p11 }
  0x42   :  { %3541 = vmatpush3.bf16.msra.mxu0 %v4149_v12 }
  0x43   :  { %3548 = vmatprep.subr.bf16.mxu0 %v4028_v7  ;;  %p3953_p0 = pnand %p3952_p13, %p3946_p10 }
  0x44   :  { %3547 = vmatpush3.bf16.msra.mxu1 %v4149_v12 }
  0x45   :  { %3235 = vmatmul.mubr.msk.f32.vlgmr.msra.gmra.mrb[0].mxu0 %vm177_vm4, %v85_v13  ;;  %3275 = vmatprep.subr.mxu1 %v4026_v0 }
  0x46   :  { %3261 = vmatprep.mubr.msk.f32.mxu0 %vm4027_vm0, %v4026_v0  ;;  %3550 = vmatpush3.bf16.msra.mxu0 %v4169_v34 }
  0x47   :  { %3551 = vmatprep.subr.bf16.mxu0 %v4028_v7 }
  0x4a   :  { %3553 = vmatpush3.bf16.msra.mxu0 %v4175_v37 }
  0x4b   :  { %3554 = vmatprep.subr.bf16.mxu0 %v4028_v7 }
 0x118   :  { %v247_v15 = vpop.f32.mrb[0].mxu0 }
 0x119   :  { %v3686_v16 = vadd.f32 %v4159_v14, %v247_v15  ;;  %v3236_v17 = vpop.f32.mrb[1].mxu0 }
 0x11b   :  { %3748 = vtanh.f32 %v3686_v16  ;;  %v3024_v20 = vmul.f32 -1.442695, %v3686_v16 }
 0x11d   :  { %3750 = vpow2.f32 %v3024_v20 }
 0x125   :  { %v3749_v18 = vpop.eup %3748 }
 0x126   :  { %265 = vrot.lane.b32.xlu0 %v3749_v18, %s4029_s16 }
 0x127   :  { %v3751_v21 = vpop.eup %3750 }
 0x128   :  { %v255_v22 = vadd.f32 1.0, %v3751_v21 }
 0x12a   :  { %260 = vrot.lane.b32.xlu0 %v88_v19, %s4021_s9  ;;  %3752 = vrcp.f32 %v255_v22  ;;  %v630_v22 = vrot.slane %v4129_v2, 2 }
 0x134   :  { %v3753_v23 = vpop.eup %3752 }
 0x198   :  { %v266_v24 = vpop.permute.xlu0 %265 }
 0x199   :  { %v268_v25 = vmul.f32 %v3753_v23, %v266_v24 }
 0x19b   :  { %270 = vrot.lane.b32.xlu1 %v268_v25, %s4021_s9 }
 0x19c   :  { %v261_v26 = vpop.permute.xlu0 %260 }
 0x19d   :  { %v263_v27 = vmul.f32 %v3753_v23, %v261_v26 }
 0x20d   :  { %v271_v28 = vpop.permute.xlu1 %270 }
 0x20e   :  { %v4165_v29 = vadd.f32 %v271_v28, %v263_v27 }
 0x210   :  { %3754 = vtanh.f32 %v4165_v29 }
 0x21a   :  { %v3755_v38 = vpop.eup %3754 }
 0x21b   :  { %276 = vrot.lane.b32.xlu1 %v3755_v38, %s4029_s16 }
 0x28d   :  { %v277_v39 = vpop.permute.xlu1 %276 }
 0x28e   :  { %v279_v40 = vmul.f32 %v3753_v23, %v277_v39  ;;  %v631_v23 = vrot.slane %v4134_v3, 1 }
 0x290   :  { %355 = vrot.lane.b32.xlu0 %v279_v40, %s4021_s9  ;;  %v632_v25 = vsel %vm98_vm2, %v631_v23, %v630_v22 }
 0x302   :  { %v356_v46 = vpop.permute.xlu0 %355 }
 0x303   :  { %3251 = vmatmul.mubr.msk.f32.vlgmr.msra.gmra.mrb[0].mxu1 %vm177_vm4, %v356_v46  ;;  %3262 = vmatmul.mubr.msk.f32.vlgmr.msra.gmra.mrb[2].mxu0 %vm177_vm4, %v356_v46 }
 0x304   :  { %3556 = vmatpush3.bf16.msra.mxu0 %v4188_v43  ;;  %3272 = vmatprep.mubr.msk.f32.mxu0 %vm4027_vm0, %v4026_v0 }
 0x305   :  { %3557 = vmatprep.subr.bf16.mxu0 %v4028_v7  ;;  %3276 = vmatpush3.msk.msra.mxu1 %vm103_vm1, %v4124_v1 }
 0x306   :  { %3277 = vmatprep.mubr.msk.f32.mxu1 %vm4027_vm0, %v4026_v0  ;;  %3560 = vmatprep.subr.bf16.mxu1 %v4028_v7 }
 0x307   :  { %3278 = vmatmul.mubr.msk.f32.vlgmr.msra.gmra.mrb[2].mxu1 %vm100_vm3, %v632_v25 }
 0x308   :  { %3559 = vmatpush3.bf16.msra.mxu0 %v4193_v47  ;;  %3562 = vmatpush3.bf16.msra.mxu1 %v4142_v8 }
 0x309   :  { %3578 = vmatprep.subr.bf16.mxu0 %v4028_v7  ;;  %3288 = vmatprep.mubr.msk.f32.mxu1 %vm4027_vm0, %v4026_v0 }
 0x30a   :  { %3563 = vmatprep.subr.bf16.mxu1 %v4028_v7 }
 0x30b   :  { %3273 = vmatmul.mubr.msk.f32.vlgmr.msra.gmra.mrb[2].mxu0 %vm177_vm4, %v87_v48 }
 0x30c   :  { %3580 = vmatpush3.bf16.msra.mxu0 %v4142_v8  ;;  %3326 = vmatprep.mubr.msk.f32.mxu0 %vm4027_vm0, %v4026_v0 }
 0x30d   :  { %3581 = vmatprep.subr.bf16.mxu0 %v4028_v7  ;;  %3565 = vmatpush3.bf16.msra.mxu1 %v4149_v12 }
 0x30e   :  { %3566 = vmatprep.subr.bf16.mxu1 %v4028_v7 }
 0x310   :  { %3583 = vmatpush3.bf16.msra.mxu0 %v4149_v12 }
 0x311   :  { %3584 = vmatprep.subr.bf16.mxu0 %v4028_v7 }
 0x3d6   :  { %v425_v49 = vpop.f32.mrb[0].mxu1 }
 0x3d7   :  { %v3687_v50 = vadd.f32 %v4159_v14, %v425_v49  ;;  %v3252_v51 = vpop.f32.mrb[1].mxu1 }
 0x3d9   :  { %3756 = vtanh.f32 %v3687_v50  ;;  %v3028_v59 = vmul.f32 -1.442695, %v3687_v50 }
 0x3de   :  { %v597_v53 = vpop.f32.mrb[2].mxu0 }
 0x3df   :  { %v3688_v54 = vadd.f32 %v4213_v52, %v597_v53  ;;  %v3274_v55 = vpop.f32.mrb[3].mxu0 }
 0x3e1   :  { %3758 = vtanh.f32 %v3688_v54  ;;  %v3032_v60 = vmul.f32 -1.442695, %v3688_v54 }
 0x3e2   :  { %3760 = vpow2.f32 %v3028_v59 }
 0x3e3   :  { %v3757_v56 = vpop.eup %3756  ;;  %3762 = vpow2.f32 %v3032_v60 }
 0x3e4   :  { %439 = vrot.lane.b32.xlu1 %v3757_v56, %s4029_s16 }
 0x3eb   :  { %v3759_v57 = vpop.eup %3758 }
 0x3ec   :  { %615 = vrot.lane.b32.xlu0 %v3759_v57, %s4029_s16  ;;  %v3761_v61 = vpop.eup %3760 }
 0x3ed   :  { %v433_v62 = vadd.f32 1.0, %v3761_v61  ;;  %v3763_v63 = vpop.eup %3762 }
 0x3ee   :  { %v605_v4 = vadd.f32 1.0, %v3763_v63 }
 0x3ef   :  { %3764 = vrcp.f32 %v433_v62 }
 0x3f0   :  { %610 = vrot.lane.b32.xlu0 %v90_v58, %s4021_s9  ;;  %3766 = vrcp.f32 %v605_v4 }
 0x3f9   :  { %v3765_v5 = vpop.eup %3764 }
 0x3fa   :  { %v3767_v10 = vpop.eup %3766  ;;  %v437_v15 = vmul.f32 %v3765_v5, %v4165_v29 }
 0x456   :  { %v440_v6 = vpop.permute.xlu1 %439 }
 0x457   :  { %v442_v9 = vmul.f32 %v3765_v5, %v440_v6  ;;  %v976_v6 = vrot.slane %v4134_v3, 2 }
 0x459   :  { %444 = vrot.lane.b32.xlu1 %v442_v9, %s4021_s9 }
 0x45e   :  { %v616_v11 = vpop.permute.xlu0 %615 }
 0x45f   :  { %v618_v13 = vmul.f32 %v3767_v10, %v616_v11 }
 0x461   :  { %620 = vrot.lane.b32.xlu1 %v618_v13, %s4021_s9 }
 0x462   :  { %v611_v18 = vpop.permute.xlu0 %610 }
 0x463   :  { %v613_v19 = vmul.f32 %v3767_v10, %v611_v18 }
 0x4cb   :  { %v445_v16 = vpop.permute.xlu1 %444 }
 0x4cc   :  { %v4222_v17 = vadd.f32 %v445_v16, %v437_v15 }
 0x4ce   :  { %3768 = vtanh.f32 %v4222_v17 }
 0x4d3   :  { %v621_v20 = vpop.permute.xlu1 %620 }
 0x4d4   :  { %v4225_v21 = vadd.f32 %v621_v20, %v613_v19 }
 0x4d6   :  { %3770 = vtanh.f32 %v4225_v21 }
 0x4d8   :  { %v3769_v24 = vpop.eup %3768 }
 0x4d9   :  { %450 = vrot.lane.b32.xlu0 %v3769_v24, %s4029_s16 }
 0x4e0   :  { %v3771_v26 = vpop.eup %3770 }
 0x4e1   :  { %626 = vrot.lane.b32.xlu1 %v3771_v26, %s4029_s16 }
 0x54b   :  { %v451_v27 = vpop.permute.xlu0 %450 }
 0x54c   :  { %v453_v28 = vmul.f32 %v3765_v5, %v451_v27  ;;  %v975_v5 = vrot.slane %v4129_v2, 3 }
 0x54e   :  { %706 = vrot.lane.b32.xlu0 %v453_v28, %s4021_s9  ;;  %v977_v9 = vsel %vm98_vm2, %v976_v6, %v975_v5 }
 0x553   :  { %v627_v29 = vpop.permute.xlu1 %626 }
 0x554   :  { %v629_v30 = vmul.f32 %v3767_v10, %v627_v29 }
 0x556   :  { %876 = vrot.lane.b32.xlu1 %v629_v30, %s4021_s9 }
 0x5c0   :  { %v707_v31 = vpop.permute.xlu0 %706 }
 0x5c1   :  { %3289 = vmatmul.mubr.msk.f32.vlgmr.msra.gmra.mrb[2].mxu1 %vm177_vm4, %v707_v31 }
 0x5c2   :  { %3568 = vmatpush3.bf16.msra.mxu1 %v4169_v34  ;;  %3299 = vmatprep.mubr.msk.f32.mxu1 %vm4027_vm0, %v4026_v0 }
 0x5c3   :  { %3569 = vmatprep.subr.bf16.mxu1 %v4028_v7 }
 0x5c6   :  { %3571 = vmatpush3.bf16.msra.mxu1 %v4175_v37 }
 0x5c7   :  { %3572 = vmatprep.subr.bf16.mxu1 %v4028_v7 }
 0x5c8   :  { %v877_v32 = vpop.permute.xlu1 %876 }
 0x5c9   :  { %3300 = vmatmul.mubr.msk.f32.vlgmr.msra.gmra.mrb[4].mxu1 %vm177_vm4, %v707_v31 }
 0x5ca   :  { %3574 = vmatpush3.bf16.msra.mxu1 %v4188_v43  ;;  %3310 = vmatprep.mubr.msk.f32.mxu1 %vm4027_vm0, %v4026_v0 }
 0x5cb   :  { %3575 = vmatprep.subr.bf16.mxu1 %v4028_v7 }
 0x5ce   :  { %3577 = vmatpush3.bf16.msra.mxu1 %v4193_v47 }
 0x5cf   :  { %3313 = vmatprep.subr.mxu1 %v4026_v0 }
 0x5d1   :  { %3311 = vmatmul.mubr.msk.f32.vlgmr.msra.gmra.mrb[4].mxu1 %vm177_vm4, %v877_v32 }
 0x5d2   :  { %3314 = vmatpush3.msk.msra.mxu1 %vm103_vm1, %v4124_v1  ;;  %3315 = vmatprep.mubr.msk.f32.mxu1 %vm4027_vm0, %v4026_v0 }
 0x5d3   :  { %3351 = vmatprep.subr.mxu1 %v4026_v0 }
 0x5d5   :  { %3316 = vmatmul.mubr.msk.f32.vlgmr.msra.gmra.mrb[6].mxu1 %vm100_vm3, %v977_v9 }
 0x5d6   :  { %3352 = vmatpush3.msk.msra.mxu1 %vm103_vm1, %v4124_v1  ;;  %3353 = vmatprep.mubr.msk.f32.mxu1 %vm4027_vm0, %v4026_v0 }
 0x5d7   :  { %3596 = vmatprep.subr.bf16.mxu1 %v4028_v7 }
 0x694   :  { %v776_v33 = vpop.f32.mrb[2].mxu1 }
 0x695   :  { %v3689_v35 = vadd.f32 %v4159_v14, %v776_v33  ;;  %v3290_v36 = vpop.f32.mrb[3].mxu1 }
 0x697   :  { %3772 = vtanh.f32 %v3689_v35  ;;  %v3036_v44 = vmul.f32 -1.442695, %v3689_v35 }
 0x6a1   :  { %v3773_v38 = vpop.eup %3772 }
 0x6a2   :  { %790 = vrot.lane.b32.xlu0 %v3773_v38, %s4029_s16 }
 0x6a4   :  { %v946_v39 = vpop.f32.mrb[4].mxu1 }
 0x6a5   :  { %v3690_v40 = vadd.f32 %v4213_v52, %v946_v39  ;;  %v3312_v41 = vpop.f32.mrb[5].mxu1 }
 0x6a7   :  { %3774 = vtanh.f32 %v3690_v40  ;;  %v3039_v46 = vmul.f32 -1.442695, %v3690_v40 }
 0x6a8   :  { %3776 = vpow2.f32 %v3036_v44 }
 0x6a9   :  { %3778 = vpow2.f32 %v3039_v46 }
 0x6b1   :  { %v3775_v42 = vpop.eup %3774 }
 0x6b2   :  { %960 = vrot.lane.b32.xlu1 %v3775_v42, %s4029_s16  ;;  %v3777_v45 = vpop.eup %3776 }
 0x6b3   :  { %v784_v48 = vadd.f32 1.0, %v3777_v45  ;;  %v3779_v49 = vpop.eup %3778 }
 0x6b4   :  { %v954_v54 = vadd.f32 1.0, %v3779_v49 }
 0x6b5   :  { %3780 = vrcp.f32 %v784_v48 }
 0x6b6   :  { %3782 = vrcp.f32 %v954_v54  ;;  %v1320_v54 = vrot.slane %v4129_v2, 4 }
 0x6bf   :  { %v3781_v50 = vpop.eup %3780 }
 0x6c0   :  { %v3783_v55 = vpop.eup %3782  ;;  %v788_v58 = vmul.f32 %v3781_v50, %v4222_v17  ;;  %v1046_v17 = vpop.f32.mrb[6].mxu1 }
 0x6c1   :  { %v958_v62 = vmul.f32 %v3783_v55, %v4225_v21  ;;  %v3317_v18 = vpop.f32.mrb[7].mxu1  ;;  %v1047_v21 = vadd.f32 %v4159_v14, %v1046_v17 }
 0x714   :  { %v791_v51 = vpop.permute.xlu0 %790 }
 0x715   :  { %v793_v53 = vmul.f32 %v3781_v50, %v791_v51 }
 0x717   :  { %795 = vrot.lane.b32.xlu0 %v793_v53, %s4021_s9 }
 0x724   :  { %v961_v56 = vpop.permute.xlu1 %960 }
 0x725   :  { %v963_v57 = vmul.f32 %v3783_v55, %v961_v56 }
 0x727   :  { %965 = vrot.lane.b32.xlu1 %v963_v57, %s4021_s9 }
 0x789   :  { %v796_v59 = vpop.permute.xlu0 %795 }
 0x78a   :  { %v4269_v60 = vadd.f32 %v796_v59, %v788_v58 }
 0x78c   :  { %3784 = vtanh.f32 %v4269_v60 }
 0x796   :  { %v3785_v61 = vpop.eup %3784 }
 0x797   :  { %801 = vrot.lane.b32.xlu0 %v3785_v61, %s4029_s16 }
 0x799   :  { %v966_v63 = vpop.permute.xlu1 %965 }
 0x79a   :  { %v4274_v4 = vadd.f32 %v966_v63, %v958_v62 }
 0x79c   :  { %3786 = vtanh.f32 %v4274_v4 }
 0x7a6   :  { %v3787_v10 = vpop.eup %3786 }
 0x7a7   :  { %971 = vrot.lane.b32.xlu1 %v3787_v10, %s4029_s16 }
 0x809   :  { %v802_v11 = vpop.permute.xlu0 %801 }
 0x80a   :  { %v804_v13 = vmul.f32 %v3781_v50, %v802_v11 }
 0x80c   :  { %1051 = vrot.lane.b32.xlu0 %v804_v13, %s4021_s9 }
 0x819   :  { %v972_v15 = vpop.permute.xlu1 %971 }
 0x81a   :  { %v974_v16 = vmul.f32 %v3783_v55, %v972_v15  ;;  %v1321_v55 = vrot.slane %v4134_v3, 3 }
 0x81c   :  { %1221 = vrot.lane.b32.xlu1 %v974_v16, %s4021_s9  ;;  %v1322_v56 = vsel %vm98_vm2, %v1321_v55, %v1320_v54 }
 0x81d   :  { %3354 = vmatmul.mubr.msk.f32.vlgmr.msra.gmra.mrb[8].mxu1 %vm100_vm3, %v1322_v56 }
 0x81e   :  { %3598 = vmatpush3.bf16.msra.mxu1 %v4142_v8  ;;  %3364 = vmatprep.mubr.msk.f32.mxu1 %vm4027_vm0, %v4026_v0 }
 0x81f   :  { %3599 = vmatprep.subr.bf16.mxu1 %v4028_v7 }
 0x822   :  { %3601 = vmatpush3.bf16.msra.mxu1 %v4149_v12 }
 0x823   :  { %3602 = vmatprep.subr.bf16.mxu1 %v4028_v7 }
 0x87e   :  { %v1052_v19 = vpop.permute.xlu0 %1051 }
 0x87f   :  { %3327 = vmatmul.mubr.msk.f32.vlgmr.msra.gmra.mrb[4].mxu0 %vm177_vm4, %v1052_v19 }
 0x880   :  { %3586 = vmatpush3.bf16.msra.mxu0 %v4169_v34  ;;  %3337 = vmatprep.mubr.msk.f32.mxu0 %vm4027_vm0, %v4026_v0 }
 0x881   :  { %3587 = vmatprep.subr.bf16.mxu0 %v4028_v7 }
 0x884   :  { %3589 = vmatpush3.bf16.msra.mxu0 %v4175_v37 }
 0x885   :  { %3590 = vmatprep.subr.bf16.mxu0 %v4028_v7 }
 0x887   :  { %3338 = vmatmul.mubr.msk.f32.vlgmr.msra.gmra.mrb[6].mxu0 %vm177_vm4, %v1052_v19 }
 0x888   :  { %3592 = vmatpush3.bf16.msra.mxu0 %v4188_v43  ;;  %3348 = vmatprep.mubr.msk.f32.mxu0 %vm4027_vm0, %v4026_v0 }
 0x889   :  { %3593 = vmatprep.subr.bf16.mxu0 %v4028_v7 }
 0x88c   :  { %3595 = vmatpush3.bf16.msra.mxu0 %v4193_v47 }
 0x88d   :  { %3389 = vmatprep.subr.mxu0 %v4026_v0 }
 0x88e   :  { %v1222_v20 = vpop.permute.xlu1 %1221 }
 0x88f   :  { %3349 = vmatmul.mubr.msk.f32.vlgmr.msra.gmra.mrb[6].mxu0 %vm177_vm4, %v1222_v20 }
 0x890   :  { %3390 = vmatpush3.msk.msra.mxu0 %vm103_vm1, %v4124_v1  ;;  %3391 = vmatprep.mubr.msk.f32.mxu0 %vm4027_vm0, %v4026_v0 }
 0x891   :  { %3614 = vmatprep.subr.bf16.mxu0 %v4028_v7 }
 0x952   :  { %v1121_v22 = vpop.f32.mrb[4].mxu0 }
 0x953   :  { %v1125_v23 = vadd.f32 %v1121_v22, %v1047_v21  ;;  %v3328_v24 = vpop.f32.mrb[5].mxu0 }
 0x955   :  { %3788 = vtanh.f32 %v1125_v23  ;;  %v3043_v30 = vmul.f32 -1.442695, %v1125_v23 }
 0x95f   :  { %v3789_v25 = vpop.eup %3788 }
 0x960   :  { %1135 = vrot.lane.b32.xlu0 %v3789_v25, %s4029_s16 }
 0x962   :  { %v1291_v26 = vpop.f32.mrb[6].mxu0 }
 0x963   :  { %v3693_v27 = vadd.f32 %v4213_v52, %v1291_v26  ;;  %v3350_v28 = vpop.f32.mrb[7].mxu0 }
 0x965   :  { %3790 = vtanh.f32 %v3693_v27  ;;  %v3046_v32 = vmul.f32 -1.442695, %v3693_v27 }
 0x966   :  { %3792 = vpow2.f32 %v3043_v30 }
 0x967   :  { %3794 = vpow2.f32 %v3046_v32 }
 0x96f   :  { %v3791_v29 = vpop.eup %3790 }
 0x970   :  { %1305 = vrot.lane.b32.xlu1 %v3791_v29, %s4029_s16  ;;  %v3793_v31 = vpop.eup %3792 }
 0x971   :  { %v1129_v33 = vadd.f32 1.0, %v3793_v31  ;;  %v3795_v35 = vpop.eup %3794 }
 0x972   :  { %v1299_v40 = vadd.f32 1.0, %v3795_v35 }
 0x973   :  { %3796 = vrcp.f32 %v1129_v33 }
 0x974   :  { %3798 = vrcp.f32 %v1299_v40 }
 0x97d   :  { %v3797_v36 = vpop.eup %3796 }
 0x97e   :  { %v3799_v41 = vpop.eup %3798  ;;  %v1133_v45 = vmul.f32 %v3797_v36, %v4269_v60 }
 0x97f   :  { %v1303_v50 = vmul.f32 %v3799_v41, %v4274_v4 }
 0x9d2   :  { %v1136_v38 = vpop.permute.xlu0 %1135 }
 0x9d3   :  { %v1138_v39 = vmul.f32 %v3797_v36, %v1136_v38  ;;  %v1666_v38 = vrot.slane %v4134_v3, 4 }
 0x9d5   :  { %1140 = vrot.lane.b32.xlu0 %v1138_v39, %s4021_s9 }
 0x9e2   :  { %v1306_v42 = vpop.permute.xlu1 %1305 }
 0x9e3   :  { %v1308_v44 = vmul.f32 %v3799_v41, %v1306_v42 }
 0x9e5   :  { %1310 = vrot.lane.b32.xlu1 %v1308_v44, %s4021_s9 }
 0xa47   :  { %v1141_v46 = vpop.permute.xlu0 %1140 }
 0xa48   :  { %v4316_v48 = vadd.f32 %v1141_v46, %v1133_v45 }
 0xa4a   :  { %3800 = vtanh.f32 %v4316_v48 }
 0xa54   :  { %v3801_v49 = vpop.eup %3800 }
 0xa55   :  { %1146 = vrot.lane.b32.xlu0 %v3801_v49, %s4029_s16 }
 0xa57   :  { %v1311_v51 = vpop.permute.xlu1 %1310 }
 0xa58   :  { %v4321_v53 = vadd.f32 %v1311_v51, %v1303_v50 }
 0xa5a   :  { %3802 = vtanh.f32 %v4321_v53 }
 0xa64   :  { %v3803_v57 = vpop.eup %3802 }
 0xa65   :  { %1316 = vrot.lane.b32.xlu1 %v3803_v57, %s4029_s16 }
 0xac7   :  { %v1147_v58 = vpop.permute.xlu0 %1146 }
 0xac8   :  { %v1149_v59 = vmul.f32 %v3797_v36, %v1147_v58  ;;  %v1665_v36 = vrot.slane %v4129_v2, 5 }
 0xaca   :  { %1396 = vrot.lane.b32.xlu0 %v1149_v59, %s4021_s9  ;;  %v1667_v39 = vsel %vm98_vm2, %v1666_v38, %v1665_v36 }
 0xacb   :  { %3392 = vmatmul.mubr.msk.f32.vlgmr.msra.gmra.mrb[8].mxu0 %vm100_vm3, %v1667_v39 }
 0xacc   :  { %3616 = vmatpush3.bf16.msra.mxu0 %v4142_v8  ;;  %3402 = vmatprep.mubr.msk.f32.mxu0 %vm4027_vm0, %v4026_v0 }
 0xacd   :  { %3617 = vmatprep.subr.bf16.mxu0 %v4028_v7 }
 0xad0   :  { %3619 = vmatpush3.bf16.msra.mxu0 %v4149_v12 }
 0xad1   :  { %3620 = vmatprep.subr.bf16.mxu0 %v4028_v7 }
 0xad7   :  { %v1317_v60 = vpop.permute.xlu1 %1316 }
 0xad8   :  { %v1319_v61 = vmul.f32 %v3799_v41, %v1317_v60 }
 0xada   :  { %1566 = vrot.lane.b32.xlu1 %v1319_v61, %s4021_s9 }
 0xb3c   :  { %v1397_v62 = vpop.permute.xlu0 %1396 }
 0xb3d   :  { %3365 = vmatmul.mubr.msk.f32.vlgmr.msra.gmra.mrb[8].mxu1 %vm177_vm4, %v1397_v62 }
 0xb3e   :  { %3604 = vmatpush3.bf16.msra.mxu1 %v4169_v34  ;;  %3375 = vmatprep.mubr.msk.f32.mxu1 %vm4027_vm0, %v4026_v0 }
 0xb3f   :  { %3605 = vmatprep.subr.bf16.mxu1 %v4028_v7 }
 0xb42   :  { %3607 = vmatpush3.bf16.msra.mxu1 %v4175_v37 }
 0xb43   :  { %3608 = vmatprep.subr.bf16.mxu1 %v4028_v7 }
 0xb45   :  { %3376 = vmatmul.mubr.msk.f32.vlgmr.msra.gmra.mrb[10].mxu1 %vm177_vm4, %v1397_v62 }
 0xb46   :  { %3610 = vmatpush3.bf16.msra.mxu1 %v4188_v43  ;;  %3386 = vmatprep.mubr.msk.f32.mxu1 %vm4027_vm0, %v4026_v0 }
 0xb47   :  { %3611 = vmatprep.subr.bf16.mxu1 %v4028_v7 }
 0xb4a   :  { %3613 = vmatpush3.bf16.msra.mxu1 %v4193_v47 }
 0xb4b   :  { %3427 = vmatprep.subr.mxu1 %v4026_v0 }
 0xb4c   :  { %v1567_v63 = vpop.permute.xlu1 %1566 }
 0xb4d   :  { %3387 = vmatmul.mubr.msk.f32.vlgmr.msra.gmra.mrb[10].mxu1 %vm177_vm4, %v1567_v63 }
 0xb4e   :  { %3428 = vmatpush3.msk.msra.mxu1 %vm103_vm1, %v4124_v1  ;;  %3429 = vmatprep.mubr.msk.f32.mxu1 %vm4027_vm0, %v4026_v0 }
 0xb4f   :  { %3632 = vmatprep.subr.bf16.mxu1 %v4028_v7 }
 0xc10   :  { %v1466_v4 = vpop.f32.mrb[8].mxu1 }
 0xc11   :  { %v3694_v5 = vadd.f32 %v4159_v14, %v1466_v4  ;;  %v3366_v6 = vpop.f32.mrb[9].mxu1 }
 0xc13   :  { %3804 = vtanh.f32 %v3694_v5  ;;  %v3050_v16 = vmul.f32 -1.442695, %v3694_v5 }
 0xc1d   :  { %v3805_v9 = vpop.eup %3804 }
 0xc1e   :  { %1480 = vrot.lane.b32.xlu0 %v3805_v9, %s4029_s16 }
 0xc20   :  { %v1636_v10 = vpop.f32.mrb[10].mxu1 }
 0xc21   :  { %v3695_v11 = vadd.f32 %v4213_v52, %v1636_v10  ;;  %v3388_v13 = vpop.f32.mrb[11].mxu1 }
 0xc23   :  { %3806 = vtanh.f32 %v3695_v11  ;;  %v3053_v18 = vmul.f32 -1.442695, %v3695_v11 }
 0xc24   :  { %3808 = vpow2.f32 %v3050_v16 }
 0xc25   :  { %3810 = vpow2.f32 %v3053_v18 }
 0xc2d   :  { %v3807_v15 = vpop.eup %3806 }
 0xc2e   :  { %1650 = vrot.lane.b32.xlu1 %v3807_v15, %s4029_s16  ;;  %v3809_v17 = vpop.eup %3808 }
 0xc2f   :  { %v1474_v19 = vadd.f32 1.0, %v3809_v17  ;;  %v3811_v20 = vpop.eup %3810 }
 0xc30   :  { %v1644_v24 = vadd.f32 1.0, %v3811_v20  ;;  %v2010_v20 = vrot.slane %v4129_v2, 6 }
 0xc31   :  { %3812 = vrcp.f32 %v1474_v19 }
 0xc32   :  { %3814 = vrcp.f32 %v1644_v24 }
 0xc3b   :  { %v3813_v21 = vpop.eup %3812 }
 0xc3c   :  { %v3815_v25 = vpop.eup %3814  ;;  %v1478_v28 = vmul.f32 %v3813_v21, %v4316_v48 }
 0xc3d   :  { %v1648_v32 = vmul.f32 %v3815_v25, %v4321_v53 }
 0xc90   :  { %v1481_v22 = vpop.permute.xlu0 %1480 }
 0xc91   :  { %v1483_v23 = vmul.f32 %v3813_v21, %v1481_v22 }
 0xc93   :  { %1485 = vrot.lane.b32.xlu0 %v1483_v23, %s4021_s9 }
 0xca0   :  { %v1651_v26 = vpop.permute.xlu1 %1650 }
 0xca1   :  { %v1653_v27 = vmul.f32 %v3815_v25, %v1651_v26 }
 0xca3   :  { %1655 = vrot.lane.b32.xlu1 %v1653_v27, %s4021_s9 }
 0xd05   :  { %v1486_v29 = vpop.permute.xlu0 %1485 }
 0xd06   :  { %v4364_v30 = vadd.f32 %v1486_v29, %v1478_v28 }
 0xd08   :  { %3816 = vtanh.f32 %v4364_v30 }
 0xd12   :  { %v3817_v31 = vpop.eup %3816 }
 0xd13   :  { %1491 = vrot.lane.b32.xlu0 %v3817_v31, %s4029_s16 }
 0xd15   :  { %v1656_v33 = vpop.permute.xlu1 %1655 }
 0xd16   :  { %v4369_v35 = vadd.f32 %v1656_v33, %v1648_v32 }
 0xd18   :  { %3818 = vtanh.f32 %v4369_v35 }
 0xd22   :  { %v3819_v40 = vpop.eup %3818 }
 0xd23   :  { %1661 = vrot.lane.b32.xlu1 %v3819_v40, %s4029_s16 }
 0xd85   :  { %v1492_v41 = vpop.permute.xlu0 %1491 }
 0xd86   :  { %v1494_v42 = vmul.f32 %v3813_v21, %v1492_v41  ;;  %v2011_v21 = vrot.slane %v4134_v3, 5 }
 0xd88   :  { %1741 = vrot.lane.b32.xlu0 %v1494_v42, %s4021_s9  ;;  %v2012_v22 = vsel %vm98_vm2, %v2011_v21, %v2010_v20 }
 0xd89   :  { %3430 = vmatmul.mubr.msk.f32.vlgmr.msra.gmra.mrb[12].mxu1 %vm100_vm3, %v2012_v22 }
 0xd8a   :  { %3634 = vmatpush3.bf16.msra.mxu1 %v4142_v8  ;;  %3440 = vmatprep.mubr.msk.f32.mxu1 %vm4027_vm0, %v4026_v0 }
 0xd8b   :  { %3635 = vmatprep.subr.bf16.mxu1 %v4028_v7 }
 0xd8e   :  { %3637 = vmatpush3.bf16.msra.mxu1 %v4149_v12 }
 0xd8f   :  { %3638 = vmatprep.subr.bf16.mxu1 %v4028_v7 }
 0xd95   :  { %v1662_v44 = vpop.permute.xlu1 %1661 }
 0xd96   :  { %v1664_v45 = vmul.f32 %v3815_v25, %v1662_v44 }
 0xd98   :  { %1911 = vrot.lane.b32.xlu1 %v1664_v45, %s4021_s9 }
 0xdfa   :  { %v1742_v46 = vpop.permute.xlu0 %1741 }
 0xdfb   :  { %3403 = vmatmul.mubr.msk.f32.vlgmr.msra.gmra.mrb[8].mxu0 %vm177_vm4, %v1742_v46 }
 0xdfc   :  { %3622 = vmatpush3.bf16.msra.mxu0 %v4169_v34  ;;  %3413 = vmatprep.mubr.msk.f32.mxu0 %vm4027_vm0, %v4026_v0 }
 0xdfd   :  { %3623 = vmatprep.subr.bf16.mxu0 %v4028_v7 }
 0xe00   :  { %3625 = vmatpush3.bf16.msra.mxu0 %v4175_v37 }
 0xe01   :  { %3626 = vmatprep.subr.bf16.mxu0 %v4028_v7 }
 0xe03   :  { %3414 = vmatmul.mubr.msk.f32.vlgmr.msra.gmra.mrb[10].mxu0 %vm177_vm4, %v1742_v46 }
 0xe04   :  { %3628 = vmatpush3.bf16.msra.mxu0 %v4188_v43  ;;  %3424 = vmatprep.mubr.msk.f32.mxu0 %vm4027_vm0, %v4026_v0 }
 0xe05   :  { %3629 = vmatprep.subr.bf16.mxu0 %v4028_v7 }
 0xe08   :  { %3631 = vmatpush3.bf16.msra.mxu0 %v4193_v47 }
 0xe09   :  { %3465 = vmatprep.subr.mxu0 %v4026_v0 }
 0xe0a   :  { %v1912_v48 = vpop.permute.xlu1 %1911 }
 0xe0b   :  { %3425 = vmatmul.mubr.msk.f32.vlgmr.msra.gmra.mrb[10].mxu0 %vm177_vm4, %v1912_v48 }
 0xe0c   :  { %3466 = vmatpush3.msk.msra.mxu0 %vm103_vm1, %v4124_v1  ;;  %3467 = vmatprep.mubr.msk.f32.mxu0 %vm4027_vm0, %v4026_v0 }
 0xe0d   :  { %3650 = vmatprep.subr.bf16.mxu0 %v4028_v7 }
 0xece   :  { %v1811_v49 = vpop.f32.mrb[8].mxu0 }
 0xecf   :  { %v3696_v50 = vadd.f32 %v4159_v14, %v1811_v49  ;;  %v3404_v51 = vpop.f32.mrb[9].mxu0 }
 0xed1   :  { %3820 = vtanh.f32 %v3696_v50  ;;  %v3057_v1 = vmul.f32 -1.442695, %v3696_v50 }
 0xedb   :  { %v3821_v53 = vpop.eup %3820 }
 0xedc   :  { %1825 = vrot.lane.b32.xlu0 %v3821_v53, %s4029_s16 }
 0xede   :  { %v1981_v54 = vpop.f32.mrb[10].mxu0 }
 0xedf   :  { %v3697_v55 = vadd.f32 %v4213_v52, %v1981_v54  ;;  %v3426_v56 = vpop.f32.mrb[11].mxu0 }
 0xee1   :  { %3822 = vtanh.f32 %v3697_v55  ;;  %v3060_v59 = vmul.f32 -1.442695, %v3697_v55 }
 0xee2   :  { %3824 = vpow2.f32 %v3057_v1 }
 0xee3   :  { %3826 = vpow2.f32 %v3060_v59 }
 0xeeb   :  { %v3823_v57 = vpop.eup %3822 }
 0xeec   :  { %1995 = vrot.lane.b32.xlu1 %v3823_v57, %s4029_s16  ;;  %v3825_v58 = vpop.eup %3824 }
 0xeed   :  { %v1819_v60 = vadd.f32 1.0, %v3825_v58  ;;  %v3827_v61 = vpop.eup %3826  ;;  %v3876_v58 = vld [vmem:[%s4574_s0] sm:$0xff] }
 0xeee   :  { %v1989_v5 = vadd.f32 1.0, %v3827_v61  ;;  %v2355_v59 = vrot.slane %v3876_v58, 7 }
 0xeef   :  { %3828 = vrcp.f32 %v1819_v60  ;;  %v3877_v60 = vld [vmem:[%s4574_s0 + $0x8] sm:$0xff]  ;;  %s4030_s0 = smov 96  }
 0xef0   :  { %3830 = vrcp.f32 %v1989_v5  ;;  %v2356_v61 = vrot.slane %v3877_v60, 6 }
 0xef9   :  { %v3829_v62 = vpop.eup %3828 }
 0xefa   :  { %v3831_v6 = vpop.eup %3830  ;;  %v1823_v11 = vmul.f32 %v3829_v62, %v4364_v30 }
 0xefb   :  { %v1993_v17 = vmul.f32 %v3831_v6, %v4369_v35 }
 0xf4e   :  { %v1826_v63 = vpop.permute.xlu0 %1825 }
 0xf4f   :  { %v1828_v4 = vmul.f32 %v3829_v62, %v1826_v63 }
 0xf51   :  { %1830 = vrot.lane.b32.xlu0 %v1828_v4, %s4021_s9 }
 0xf5e   :  { %v1996_v9 = vpop.permute.xlu1 %1995 }
 0xf5f   :  { %v1998_v10 = vmul.f32 %v3831_v6, %v1996_v9 }
 0xf61   :  { %2000 = vrot.lane.b32.xlu1 %v1998_v10, %s4021_s9 }
 0xfc3   :  { %v1831_v13 = vpop.permute.xlu0 %1830 }
 0xfc4   :  { %v4412_v15 = vadd.f32 %v1831_v13, %v1823_v11 }
 0xfc6   :  { %3832 = vtanh.f32 %v4412_v15 }
 0xfd0   :  { %v3833_v16 = vpop.eup %3832 }
 0xfd1   :  { %1836 = vrot.lane.b32.xlu0 %v3833_v16, %s4029_s16 }
 0xfd3   :  { %v2001_v18 = vpop.permute.xlu1 %2000 }
 0xfd4   :  { %v4417_v19 = vadd.f32 %v2001_v18, %v1993_v17 }
 0xfd6   :  { %3834 = vtanh.f32 %v4417_v19 }
 0xfe0   :  { %v3835_v23 = vpop.eup %3834 }
 0xfe1   :  { %2006 = vrot.lane.b32.xlu1 %v3835_v23, %s4029_s16 }
0x1043   :  { %v1837_v2 = vpop.permute.xlu0 %1836 }
0x1044   :  { %v1839_v3 = vmul.f32 %v3829_v62, %v1837_v2  ;;  %v2357_v62 = vsel %vm98_vm2, %v2356_v61, %v2355_v59  ;;  %v83_v59 = vld [vmem:[#allocation7 + $0x90] sm:$0xff] }
0x1045   :  { %3468 = vmatmul.mubr.msk.f32.vlgmr.msra.gmra.mrb[12].mxu0 %vm100_vm3, %v2357_v62 }
0x1046   :  { %2086 = vrot.lane.b32.xlu0 %v1839_v3, %s4021_s9  ;;  %3652 = vmatpush3.bf16.msra.mxu0 %v4142_v8 }
0x1047   :  { %3478 = vmatprep.mubr.msk.f32.mxu0 %vm4027_vm0, %v4026_v0  ;;  %3653 = vmatprep.subr.bf16.mxu0 %v4028_v7 }
0x104a   :  { %3655 = vmatpush3.bf16.msra.mxu0 %v4149_v12 }
0x104b   :  { %3656 = vmatprep.subr.bf16.mxu0 %v4028_v7 }
0x1053   :  { %v2007_v24 = vpop.permute.xlu1 %2006 }
0x1054   :  { %v2009_v25 = vmul.f32 %v3831_v6, %v2007_v24 }
0x1056   :  { %2256 = vrot.lane.b32.xlu1 %v2009_v25, %s4021_s9 }
0x10b8   :  { %v2087_v26 = vpop.permute.xlu0 %2086 }
0x10b9   :  { %3441 = vmatmul.mubr.msk.f32.vlgmr.msra.gmra.mrb[12].mxu1 %vm177_vm4, %v2087_v26 }
0x10ba   :  { %3640 = vmatpush3.bf16.msra.mxu1 %v4169_v34  ;;  %3451 = vmatprep.mubr.msk.f32.mxu1 %vm4027_vm0, %v4026_v0 }
0x10bb   :  { %3641 = vmatprep.subr.bf16.mxu1 %v4028_v7 }
0x10be   :  { %3643 = vmatpush3.bf16.msra.mxu1 %v4175_v37 }
0x10bf   :  { %3644 = vmatprep.subr.bf16.mxu1 %v4028_v7 }
0x10c1   :  { %3452 = vmatmul.mubr.msk.f32.vlgmr.msra.gmra.mrb[14].mxu1 %vm177_vm4, %v2087_v26 }
0x10c2   :  { %3646 = vmatpush3.bf16.msra.mxu1 %v4188_v43  ;;  %3462 = vmatprep.mubr.msk.f32.mxu1 %vm4027_vm0, %v4026_v0 }
0x10c3   :  { %3647 = vmatprep.subr.bf16.mxu1 %v4028_v7 }
0x10c6   :  { %3649 = vmatpush3.bf16.msra.mxu1 %v4193_v47 }
0x10c7   :  { %3668 = vmatprep.subr.bf16.mxu1 %v4028_v7 }
0x10c8   :  { %v2257_v27 = vpop.permute.xlu1 %2256 }
0x10c9   :  { %3463 = vmatmul.mubr.msk.f32.vlgmr.msra.gmra.mrb[14].mxu1 %vm177_vm4, %v2257_v27 }
0x10ca   :  { %3670 = vmatpush3.bf16.msra.mxu1 %v4169_v34  ;;  %3511 = vmatprep.mubr.msk.f32.mxu1 %vm4027_vm0, %v4026_v0 }
0x10cb   :  { %3671 = vmatprep.subr.bf16.mxu1 %v4028_v7 }
0x10ce   :  { %3673 = vmatpush3.bf16.msra.mxu1 %v4175_v37 }
0x10cf   :  { %3674 = vmatprep.subr.bf16.mxu1 %v4028_v7 }
0x118c   :  { %v2156_v28 = vpop.f32.mrb[12].mxu1 }
0x118d   :  { %v3698_v29 = vadd.f32 %v4159_v14, %v2156_v28  ;;  %v3442_v30 = vpop.f32.mrb[13].mxu1 }
0x118f   :  { %3836 = vtanh.f32 %v3698_v29  ;;  %v3064_v38 = vmul.f32 -1.442695, %v3698_v29 }
0x1199   :  { %v3837_v31 = vpop.eup %3836 }
0x119a   :  { %2170 = vrot.lane.b32.xlu0 %v3837_v31, %s4029_s16 }
0x119c   :  { %v2326_v32 = vpop.f32.mrb[14].mxu1 }
0x119d   :  { %v3699_v33 = vadd.f32 %v4213_v52, %v2326_v32  ;;  %v3464_v35 = vpop.f32.mrb[15].mxu1 }
0x119f   :  { %3838 = vtanh.f32 %v3699_v33  ;;  %v3067_v40 = vmul.f32 -1.442695, %v3699_v33 }
0x11a0   :  { %3840 = vpow2.f32 %v3064_v38 }
0x11a1   :  { %3842 = vpow2.f32 %v3067_v40 }
0x11a9   :  { %v3839_v36 = vpop.eup %3838 }
0x11aa   :  { %2340 = vrot.lane.b32.xlu1 %v3839_v36, %s4029_s16  ;;  %v3841_v39 = vpop.eup %3840 }
0x11ab   :  { %v2164_v41 = vadd.f32 1.0, %v3841_v39  ;;  %v3843_v14 = vpop.eup %3842 }
0x11ac   :  { %v2334_v46 = vadd.f32 1.0, %v3843_v14 }
0x11ad   :  { %3844 = vrcp.f32 %v2164_v41 }
0x11ae   :  { %3846 = vrcp.f32 %v2334_v46 }
0x11b7   :  { %v3845_v42 = vpop.eup %3844 }
0x11b8   :  { %v3847_v48 = vpop.eup %3846  ;;  %v2168_v51 = vmul.f32 %v3845_v42, %v4412_v15 }
0x11b9   :  { %v2338_v56 = vmul.f32 %v3847_v48, %v4417_v19 }
0x120c   :  { %v2171_v44 = vpop.permute.xlu0 %2170 }
0x120d   :  { %v2173_v45 = vmul.f32 %v3845_v42, %v2171_v44 }
0x120f   :  { %2175 = vrot.lane.b32.xlu0 %v2173_v45, %s4021_s9 }
0x121c   :  { %v2341_v49 = vpop.permute.xlu1 %2340 }
0x121d   :  { %v2343_v50 = vmul.f32 %v3847_v48, %v2341_v49 }
0x121f   :  { %2345 = vrot.lane.b32.xlu1 %v2343_v50, %s4021_s9 }
0x1281   :  { %v2176_v53 = vpop.permute.xlu0 %2175 }
0x1282   :  { %v4461_v54 = vadd.f32 %v2176_v53, %v2168_v51 }
0x1284   :  { %3848 = vtanh.f32 %v4461_v54 }
0x128e   :  { %v3849_v55 = vpop.eup %3848 }
0x128f   :  { %2181 = vrot.lane.b32.xlu0 %v3849_v55, %s4029_s16 }
0x1291   :  { %v2346_v57 = vpop.permute.xlu1 %2345 }
0x1292   :  { %v4466_v1 = vadd.f32 %v2346_v57, %v2338_v56  ;;  %v81_v57 = vld [vmem:[#allocation7 + $0x80] sm:$0xff] }
0x1294   :  { %3850 = vtanh.f32 %v4466_v1 }
0x129e   :  { %v3851_v63 = vpop.eup %3850 }
0x129f   :  { %2351 = vrot.lane.b32.xlu1 %v3851_v63, %s4029_s16 }
0x1301   :  { %v2182_v4 = vpop.permute.xlu0 %2181 }
0x1302   :  { %v2184_v5 = vmul.f32 %v3845_v42, %v2182_v4 }
0x1304   :  { %2431 = vrot.lane.b32.xlu0 %v2184_v5, %s4021_s9 }
0x1311   :  { %v2352_v6 = vpop.permute.xlu1 %2351 }
0x1312   :  { %v2354_v9 = vmul.f32 %v3847_v48, %v2352_v6 }
0x1314   :  { %2601 = vrot.lane.b32.xlu1 %v2354_v9, %s4021_s9 }
0x1376   :  { %v2432_v8 = vpop.permute.xlu0 %2431 }
0x1377   :  { %3479 = vmatmul.mubr.msk.f32.vlgmr.msra.gmra.mrb[12].mxu0 %vm177_vm4, %v2432_v8 }
0x1378   :  { %3658 = vmatpush3.bf16.msra.mxu0 %v4169_v34  ;;  %3489 = vmatprep.mubr.msk.f32.mxu0 %vm4027_vm0, %v4026_v0 }
0x1379   :  { %3659 = vmatprep.subr.bf16.mxu0 %v4028_v7 }
0x137c   :  { %3661 = vmatpush3.bf16.msra.mxu0 %v4175_v37  ;;  %v3878_v37 = vld [vmem:[#allocation7 + $0x28] ss:$0 sm:$0xff] }
0x137d   :  { %3662 = vmatprep.subr.bf16.mxu0 %v4028_v7 }
0x137f   :  { %3490 = vmatmul.mubr.msk.f32.vlgmr.msra.gmra.mrb[14].mxu0 %vm177_vm4, %v2432_v8 }
0x1380   :  { %3664 = vmatpush3.bf16.msra.mxu0 %v4188_v43  ;;  %3500 = vmatprep.mubr.msk.f32.mxu0 %vm4027_vm0, %v4026_v0 }
0x1381   :  { %3665 = vmatprep.subr.bf16.mxu0 %v4028_v7 }
0x1384   :  { %3667 = vmatpush3.bf16.msra.mxu0 %v4193_v47 }
0x1385   :  { %3680 = vmatprep.subr.bf16.mxu0 %v4028_v7 }
0x1386   :  { %v2602_v12 = vpop.permute.xlu1 %2601 }
0x1387   :  { %3501 = vmatmul.mubr.msk.f32.vlgmr.msra.gmra.mrb[14].mxu0 %vm177_vm4, %v2602_v12 }
0x1388   :  { %3533 = vmatprep.mubr.msk.f32.mxu0 %vm4027_vm0, %v4026_v0 }
0x144a   :  { %v2501_v34 = vpop.f32.mrb[12].mxu0 }
0x144b   :  { %v3700_v10 = vadd.f32 %v3878_v37, %v2501_v34  ;;  %v3480_v11 = vpop.f32.mrb[13].mxu0 }
0x144d   :  { %3852 = vtanh.f32 %v3700_v10  ;;  %v3071_v19 = vmul.f32 -1.442695, %v3700_v10 }
0x1457   :  { %v3853_v13 = vpop.eup %3852 }
0x1458   :  { %2515 = vrot.lane.b32.xlu0 %v3853_v13, %s4029_s16 }
0x145a   :  { %v2671_v15 = vpop.f32.mrb[14].mxu0 }
0x145b   :  { %v3701_v16 = vadd.f32 %v4213_v52, %v2671_v15  ;;  %v3502_v17 = vpop.f32.mrb[15].mxu0 }
0x145d   :  { %3854 = vtanh.f32 %v3701_v16  ;;  %v3074_v21 = vmul.f32 -1.442695, %v3701_v16 }
0x145e   :  { %3856 = vpow2.f32 %v3071_v19 }
0x145f   :  { %3858 = vpow2.f32 %v3074_v21 }
0x1467   :  { %v3855_v18 = vpop.eup %3854 }
0x1468   :  { %2685 = vrot.lane.b32.xlu1 %v3855_v18, %s4029_s16  ;;  %v3857_v20 = vpop.eup %3856 }
0x1469   :  { %v2509_v22 = vadd.f32 1.0, %v3857_v20  ;;  %v3859_v23 = vpop.eup %3858 }
0x146a   :  { %v2679_v25 = vadd.f32 1.0, %v3859_v23 }
0x146b   :  { %3860 = vrcp.f32 %v2509_v22 }
0x146c   :  { %3862 = vrcp.f32 %v2679_v25 }
0x1475   :  { %v3861_v2 = vpop.eup %3860 }
0x1476   :  { %v3863_v26 = vpop.eup %3862  ;;  %v2513_v29 = vmul.f32 %v3861_v2, %v4461_v54 }
0x1477   :  { %v2683_v33 = vmul.f32 %v3863_v26, %v4466_v1  ;;  %v82_v1 = vld [vmem:[#allocation7 + $0x88] sm:$0xff] }
0x1478   :  { %v3684_v60 = vpack.c.bf16 %v83_v59, %v82_v1 }
0x14ca   :  { %v2516_v3 = vpop.permute.xlu0 %2515 }
0x14cb   :  { %v2518_v24 = vmul.f32 %v3861_v2, %v2516_v3 }
0x14cd   :  { %2520 = vrot.lane.b32.xlu0 %v2518_v24, %s4021_s9 }
0x14da   :  { %v2686_v27 = vpop.permute.xlu1 %2685 }
0x14db   :  { %v2688_v28 = vmul.f32 %v3863_v26, %v2686_v27 }
0x14dd   :  { %2690 = vrot.lane.b32.xlu1 %v2688_v28, %s4021_s9 }
0x153f   :  { %v2521_v30 = vpop.permute.xlu0 %2520 }
0x1540   :  { %v2523_v31 = vadd.f32 %v2521_v30, %v2513_v29 }
0x1542   :  { %3864 = vtanh.f32 %v2523_v31 }
0x154c   :  { %v3865_v32 = vpop.eup %3864 }
0x154d   :  { %2526 = vrot.lane.b32.xlu0 %v3865_v32, %s4029_s16 }
0x154f   :  { %v2691_v35 = vpop.permute.xlu1 %2690 }
0x1550   :  { %v2693_v36 = vadd.f32 %v2691_v35, %v2683_v33 }
0x1552   :  { %3866 = vtanh.f32 %v2693_v36 }
0x155c   :  { %v3867_v38 = vpop.eup %3866 }
0x155d   :  { %2696 = vrot.lane.b32.xlu1 %v3867_v38, %s4029_s16 }
0x15bf   :  { %v2527_v39 = vpop.permute.xlu0 %2526 }
0x15c0   :  { %v2529_v40 = vmul.f32 %v3861_v2, %v2527_v39 }
0x15c2   :  { %2701 = vrot.lane.b32.xlu0 %v2529_v40, %s4021_s9 }
0x15cf   :  { %v2697_v41 = vpop.permute.xlu1 %2696 }
0x15d0   :  { %v2699_v14 = vmul.f32 %v3863_v26, %v2697_v41 }
0x15d2   :  { %2776 = vrot.lane.b32.xlu1 %v2699_v14, %s4021_s9 }
0x1634   :  { %v2702_v42 = vpop.permute.xlu0 %2701 }
0x1635   :  { %2877 = vst.msk [vmem:[#allocation9] sm:$0x3] %vm2876_vm5, %v2702_v42  ;;  %3512 = vmatmul.mubr.msk.f32.vlgmr.msra.gmra.mrb[16].mxu1 %vm177_vm4, %v2702_v42 }
0x1636   :  { %3676 = vmatpush3.bf16.msra.mxu1 %v4188_v43  ;;  %3522 = vmatprep.mubr.msk.f32.mxu1 %vm4027_vm0, %v4026_v0 }
0x1637   :  { %3677 = vmatprep.subr.bf16.mxu1 %v4028_v7 }
0x163a   :  { %3679 = vmatpush3.bf16.msra.mxu1 %v4193_v47 }
0x1644   :  { %v2777_v44 = vpop.permute.xlu1 %2776 }
0x1645   :  { %3523 = vmatmul.mubr.msk.f32.vlgmr.msra.gmra.mrb[16].mxu1 %vm177_vm4, %v2777_v44 }
0x1718   :  { %v2846_v45 = vpop.f32.mrb[16].mxu1 }
0x1719   :  { %v3702_v46 = vadd.f32 %v4213_v52, %v2846_v45  ;;  %v3524_v48 = vpop.f32.mrb[17].mxu1  ;;  %v80_v52 = vld [vmem:[#allocation7 + $0x78] sm:$0xff] }
0x171a   :  { %v3681_v58 = vpack.c.bf16 %v81_v57, %v80_v52 }
0x171b   :  { %3868 = vtanh.f32 %v3702_v46  ;;  %v3077_v50 = vmul.f32 -1.442695, %v3702_v46 }
0x171c   :  { %3682 = vmatpush3.bf16.msra.mxu0 %v3681_v58 }
0x171d   :  { %3870 = vpow2.f32 %v3077_v50  ;;  %3683 = vmatprep.subr.bf16.mxu0 %v4028_v7 }
0x1720   :  { %3685 = vmatpush3.bf16.msra.mxu0 %v3684_v60 }
0x1725   :  { %v3869_v49 = vpop.eup %3868 }
0x1726   :  { %2860 = vrot.lane.b32.xlu0 %v3869_v49, %s4029_s16 }
0x1727   :  { %v3871_v43 = vpop.eup %3870 }
0x1728   :  { %v2854_v51 = vadd.f32 1.0, %v3871_v43 }
0x172a   :  { %3872 = vrcp.f32 %v2854_v51 }
0x1734   :  { %v3873_v0 = vpop.eup %3872 }
0x1735   :  { %v2858_v47 = vmul.f32 %v3873_v0, %v2693_v36 }
0x1798   :  { %v2861_v53 = vpop.permute.xlu0 %2860 }
0x1799   :  { %v2863_v54 = vmul.f32 %v3873_v0, %v2861_v53 }
0x179b   :  { %2865 = vrot.lane.b32.xlu1 %v2863_v54, %s4021_s9 }
0x180d   :  { %v2866_v55 = vpop.permute.xlu1 %2865 }
0x180e   :  { %v2868_v56 = vadd.f32 %v2866_v55, %v2858_v47 }
0x1810   :  { %3874 = vtanh.f32 %v2868_v56 }
0x181a   :  { %v3875_v61 = vpop.eup %3874 }
0x181b   :  { %2871 = vrot.lane.b32.xlu0 %v3875_v61, %s4029_s16 }
0x181f   :  { %2879 = vrot.lane.b32.xlu0 %v2523_v31, %s4030_s0 }
0x188d   :  { %v2872_v62 = vpop.permute.xlu0 %2871 }
0x188e   :  { %v2874_v63 = vmul.f32 %v3873_v0, %v2872_v62 }
0x1890   :  { %2884 = vrot.lane.b32.xlu1 %v2874_v63, %s4021_s9 }
0x1891   :  { %v2880_v4 = vpop.permute.xlu0 %2879 }
0x1892   :  { %2882 = vst.msk [vmem:[#allocation11] sm:$0x3] %vm2876_vm5, %v2880_v4 }
0x1894   :  { %2890 = vrot.lane.b32.xlu1 %v2868_v56, %s4030_s0 }
0x1902   :  { %v2885_v5 = vpop.permute.xlu1 %2884 }
0x1903   :  { %2888 = vst.msk [vmem:[#allocation9 + $0x2] sm:$0x3] %vm2876_vm5, %v2885_v5  ;;  %3534 = vmatmul.mubr.msk.f32.vlgmr.msra.gmra.mrb[16].mxu0 %vm177_vm4, %v2885_v5 }
0x1906   :  { %v2891_v7 = vpop.permute.xlu1 %2890 }
0x1907   :  { %2894 = vst.msk [vmem:[#allocation11 + $0x2] sm:$0x3] %vm2876_vm5, %v2891_v7 }
0x1908   :  { %3956 = shalt.err (!%p3953_p0)
}
0x1909   :  { %s3957_s26 = scalar_lea.hbm %s4579_s5, 64 }
0x190a   :  { %p3958_p1 = scmp.ne.s32.totalorder %s4579_s5, %s3957_s26  ;;  %p3961_p2 = scmp.lt.u32.totalorder %s3957_s26, %s4579_s5 }
0x190c   :  { %p3963_p3 = pnand %p3961_p2, %p3958_p1 }
0x190e   :  { %3966 = shalt.err (!%p3963_p3)
}
0x190f   :  { %2994 = dma.vmem_to_hbm [thread:$0]  %s2989_s21, 64, %s4579_s5, [#allocation10], %s4021_s9, %s4021_s9, %s4022_s10  }
0x1910   :  { %s4032_s1 = smov [#allocation11]  }
0x1911   :  { %s3000_s24 = sshll.u32 %s4032_s1, 4  ;;  %s3001_s24 = int_to_ptr.vmem [resolvable:$true] %s3000_s24 }
0x1912   :  { %s3967_s11 = scalar_lea.vmem %s3001_s24, 64  ;;  %p3972_p5 = scmp.lt.s32.totalorder %s3001_s24, %s3001_s24 }
0x1913   :  { %p3968_p4 = scmp.ne.s32.totalorder %s3001_s24, %s3967_s11  ;;  %p3973_p6 = scmp.lt.s32.totalorder %s3967_s11, %s3967_s11 }
0x1915   :  { %p3974_p7 = por %p3973_p6, %p3972_p5 }
0x1917   :  { %p3975_p8 = pnand %p3974_p7, %p3968_p4 }
0x1919   :  { %3978 = shalt.err (!%p3975_p8)
}
0x191a   :  { %s3979_s13 = scalar_lea.hbm %s4580_s6, 64 }
0x191b   :  { %p3980_p9 = scmp.ne.s32.totalorder %s4580_s6, %s3979_s13  ;;  %p3983_p10 = scmp.lt.u32.totalorder %s3979_s13, %s4580_s6 }
0x191d   :  { %p3985_p11 = pnand %p3983_p10, %p3980_p9 }
0x191f   :  { %3988 = shalt.err (!%p3985_p11)
}
0x1920   :  { %3006 = dma.vmem_to_hbm [thread:$0]  %s3001_s24, 64, %s4580_s6, [#allocation10], %s4021_s9, %s4021_s9, %s4022_s10   ;;  %v3078_v6 = vld [vmem:[#allocation7 + $0x98] ss:$0 sm:$0xff]  ;;  %vm2971_vm6 = vcmask 17408  }
0x1921   :  { %s4033_s19 = smov [#allocation8]  }
0x1922   :  { %s2979_s20 = sshll.u32 %s4033_s19, 4  ;;  %s2980_s20 = int_to_ptr.vmem [resolvable:$true] %s2979_s20 }
0x1923   :  { %s3989_s0 = scalar_lea.vmem %s2980_s20, 32  ;;  %p3994_p13 = scmp.lt.s32.totalorder %s2980_s20, %s2980_s20 }
0x1924   :  { %p3990_p12 = scmp.ne.s32.totalorder %s2980_s20, %s3989_s0  ;;  %p3995_p0 = scmp.lt.s32.totalorder %s3989_s0, %s3989_s0 }
0x1926   :  { %p3996_p1 = por %p3995_p0, %p3994_p13 }
0x1928   :  { %p3997_p2 = pnand %p3996_p1, %p3990_p12 }
0x19d6   :  { %v2967_v9 = vpop.f32.mrb[16].mxu0 }
0x19d7   :  { %v2968_v8 = vadd.f32 %v3078_v6, %v2967_v9  ;;  %v3535_v12 = vpop.f32.mrb[17].mxu0 }
0x19d9   :  { %2972 = vst.msk [vmem:[#allocation8] sm:$0x3] %vm2971_vm6, %v2968_v8 }
0x19da   :  { %4000 = shalt.err (!%p3997_p2)
}
0x19db   :  { %s4001_s6 = scalar_lea.hbm %s4578_s4, 32 }
0x19dc   :  { %p4002_p3 = scmp.ne.s32.totalorder %s4578_s4, %s4001_s6  ;;  %p4005_p4 = scmp.lt.u32.totalorder %s4001_s6, %s4578_s4 }
0x19de   :  { %p4007_p5 = pnand %p4005_p4, %p4002_p3 }
0x19e0   :  { %4010 = shalt.err (!%p4007_p5)
}
0x19e1   :  { %2982 = dma.vmem_to_hbm [thread:$0]  %s2980_s20, 32, %s4578_s4, [#allocation4]  }
0x19e2   :  { %4015 = dma.done.wait [#allocation4], 32  }
0x19e3   :  { %4016 = vsyncadd [#allocation4], 4294967264 }
0x19e4   :  { %4017 = dma.done.wait [#allocation10], 128  }
0x19e5   :  { %4018 = vsyncadd [#allocation10], 4294967168 }
0x19e6   :  { %3016 = vsyncpa [#allocation3], 1 }
0x19e7   :  { %3017 = vsyncpa [#allocation6], 1 }
0x19e8   :  { %3018 = vsyncpa [#allocation4], 1 }
0x19e9   :  { %3019 = vsyncpa [#allocation10], 1 }

</bundles_post_ra>
